<compile_context>
chip_gen: v5e
topology: v5e:2x2
jax: 0.10.0
libtpu: 0.0.40
codegen_flags: <defaults>
</compile_context>

<pallas_src>
import math
from functools import partial

import jax
import jax.numpy as jnp
from jax import lax
from jax.experimental import pallas as pl
from jax.experimental.pallas import tpu as pltpu

LOG2 = math.log(2.0)
RBF_PAD = 128        # rbf dim padded to one full lane tile (zero-padded W_f rows)
PAIR_UNROLL = 4      # manual unroll of the per-pair gather/scatter loop


def _shifted_softplus(x):
    # softplus(x) - log(2); uses only exp/log (robust Mosaic lowering),
    # numerically stable since exp(-|x|) in (0, 1].
    return jnp.maximum(x, 0.0) + jnp.log(1.0 + jnp.exp(-jnp.abs(x))) - LOG2


def _round_up(x, m):
    return ((x + m - 1) // m) * m


def _default_vmem_limit_bytes():
    # Re-derive the scoped-VMEM budget per generation (v7x has only 64 MiB of
    # physical VMEM): ~75% of capacity, clamped; 64 MiB fallback is safe on
    # v5e / v6e / v7x.
    try:
        cap = int(pltpu.get_tpu_info().vmem_capacity_bytes)
        return max(32 * 1024 * 1024, min((cap * 3) // 4, 112 * 1024 * 1024))
    except Exception:
        return 64 * 1024 * 1024


# ---------------------------------------------------------------------------
# Fused SchNet representation kernel
#   grid = (layer, pair_tile); both axes sequential ("arbitrary").
#   scalar prefetch (SMEM): idx_i, idx_j   [P_pad] int32
#   scratch: x_s   [N, C]  f32 - resident atom features (residual carried)
#            h_s   [N, Fp] f32 - h = x @ W_in + b_in for the current layer
#            w_s   [TP,Fp] f32 - per-tile filter weights (rcut folded, f32)
#            acc_s [N, Fp] f32 - scatter_add accumulator for the current layer
# ---------------------------------------------------------------------------
def _schnet_kernel(idx_i_ref, idx_j_ref,                 # SMEM scalar prefetch
                   x0_ref,                                # HBM (pl.ANY)
                   d_ref, rc_ref,                         # [TP, 1] f32 pair tiles
                   win_ref, bin_ref, wf_ref, bf_ref, wout_ref, bout_ref,
                   out_ref,
                   x_s, h_s, w_s, acc_s, dma_sem,
                   *, coeff, rbf_width):
    l = pl.program_id(0)           # layer index
    k = pl.program_id(1)           # pair-tile index
    tile_p = w_s.shape[0]

    # ---- layer prologue: (load x once), h = x @ W_in + b_in, zero accumulator
    @pl.when(k == 0)
    def _():
        @pl.when(l == 0)
        def _():
            cp = pltpu.make_async_copy(x0_ref, x_s, dma_sem)
            cp.start()
            cp.wait()
        h_s[...] = (jnp.dot(x_s[...].astype(jnp.bfloat16), win_ref[...],
                            preferred_element_type=jnp.float32)
                    + bin_ref[...])
        acc_s[...] = jnp.zeros_like(acc_s)

    # ---- filter network on this pair tile (RBF offsets built in-kernel)
    d = d_ref[...]                                                 # [TP, 1] f32
    offs = (lax.broadcasted_iota(jnp.int32, (tile_p, RBF_PAD), 1)
            .astype(jnp.float32) * rbf_width)                      # [TP, RBF_PAD]
    diff = d - offs
    f = jnp.exp(coeff * diff * diff)                               # [TP, RBF_PAD]
    w = jnp.dot(f.astype(jnp.bfloat16), wf_ref[...],
                preferred_element_type=jnp.float32) + bf_ref[...]  # [TP, Fp]
    # cosine cutoff applied in f32 (exactly zero for padded pairs)
    w_s[...] = _shifted_softplus(w) * rc_ref[...]

    # ---- per-pair gather / multiply / scatter_add (replaces the one-hot
    #      matmuls): acc[idx_i[p]] += h[idx_j[p]] * W[p]; O(TP*Fp) movement.
    base = k * tile_p
    def pair_body(p, carry):
        for u in range(PAIR_UNROLL):
            q = p * PAIR_UNROLL + u
            gp = base + q
            j = idx_j_ref[gp]
            i = idx_i_ref[gp]
            x_ij = h_s[pl.ds(j, 1), :] * w_s[pl.ds(q, 1), :]
            acc_s[pl.ds(i, 1), :] = acc_s[pl.ds(i, 1), :] + x_ij
        return carry

    lax.fori_loop(0, tile_p // PAIR_UNROLL, pair_body, 0)

    # ---- layer epilogue: v = ssp(acc @ W_out + b_out); x <- x + v
    @pl.when(k == pl.num_programs(1) - 1)
    def _():
        v = jnp.dot(acc_s[...].astype(jnp.bfloat16), wout_ref[...],
                    preferred_element_type=jnp.float32) + bout_ref[...]
        x_s[...] = x_s[...] + _shifted_softplus(v)

        @pl.when(l == pl.num_programs(0) - 1)
        def _():
            out_ref[...] = x_s[...]


# ---------------------------------------------------------------------------
# SchNetRepresentation wrapper
# ---------------------------------------------------------------------------
class SchNetRepresentationPallas:
    def __init__(self, n_atom_basis, n_filters, n_interactions, cutoff=5.0,
                 n_rbf=20, key=None, pair_tile=None):
        assert n_atom_basis == 128, "reshape(..., 128) is hard-coded upstream"
        self.n_atom_basis = n_atom_basis
        self.n_filters = n_filters
        self.n_interactions = n_interactions
        self.cutoff = float(cutoff)
        self.n_rbf = n_rbf
        self.offsets = jnp.linspace(0.0, cutoff, n_rbf, dtype=jnp.float32)
        width = float(self.offsets[1] - self.offsets[0])
        self.rbf_width = width
        self.coeff = -0.5 / (width * width)

        def linear_init(k, fan_in, fan_out):
            kw, kb = jax.random.split(k)
            bound = 1.0 / math.sqrt(fan_in)
            # stored as (in, out) so the kernel computes x @ W + b
            w = jax.random.uniform(kw, (fan_in, fan_out), jnp.float32,
                                   -bound, bound)
            b = jax.random.uniform(kb, (fan_out,), jnp.float32, -bound, bound)
            return w, b

        key = key if key is not None else jax.random.PRNGKey(0)
        self.params = []
        for _ in range(n_interactions):
            key, k1, k2, k3 = jax.random.split(key, 4)
            w_in, b_in = linear_init(k1, n_atom_basis, n_filters)    # intput_to_feature
            w_f, b_f = linear_init(k2, n_rbf, n_filters)             # filter_network
            w_out, b_out = linear_init(k3, n_filters, n_atom_basis)  # feature_to_output
            self.params.append((w_in, b_in, w_f, b_f, w_out, b_out))

        # ---- padded / stacked / bf16 parameter tensors for the fused kernel
        C = n_atom_basis
        Fp = _round_up(n_filters, 128)        # lane-dense filter dim
        self._Fp = Fp

        def pad_to(a, shape):
            out = jnp.zeros(shape, a.dtype)
            return out.at[tuple(slice(0, s) for s in a.shape)].set(a)

        win, binl, wfl, bfl, wout, boutl = [], [], [], [], [], []
        for (w_in, b_in, w_f, b_f, w_out, b_out) in self.params:
            win.append(pad_to(w_in, (C, Fp)))
            binl.append(pad_to(b_in.reshape(1, -1), (1, Fp)))
            wfl.append(pad_to(w_f, (RBF_PAD, Fp)))
            bfl.append(pad_to(b_f.reshape(1, -1), (1, Fp)))
            wout.append(pad_to(w_out, (Fp, C)))
            boutl.append(b_out.reshape(1, -1))
        self._win = jnp.stack(win).astype(jnp.bfloat16)      # [L, C, Fp]
        self._bin = jnp.stack(binl)                          # [L, 1, Fp] f32
        self._wf = jnp.stack(wfl).astype(jnp.bfloat16)       # [L, RBF_PAD, Fp]
        self._bf = jnp.stack(bfl)                            # [L, 1, Fp] f32
        self._wout = jnp.stack(wout).astype(jnp.bfloat16)    # [L, Fp, C]
        self._bout = jnp.stack(boutl)                        # [L, 1, C]  f32

        self._pair_tile = pair_tile
        self._vmem_limit = _default_vmem_limit_bytes()

    def __call__(self, x, pairlist):
        atom_index12 = pairlist["atom_index12"]        # [2, n_pairs]
        d_ij = pairlist["d_ij"].astype(jnp.float32)    # [n_pairs]
        idx_i = atom_index12[0].astype(jnp.int32)
        idx_j = atom_index12[1].astype(jnp.int32)

        B, A, C = x.shape
        assert C == self.n_atom_basis
        N = B * A
        N_pad = _round_up(max(N, 8), 8)
        P = int(d_ij.shape[0])

        # Pair tile size: a lane multiple; larger tiles amortize per-grid-step
        # overhead.  1024 on 128-MiB parts (v5e/v6e), 512 on 64-MiB parts (v7x).
        tp_cap = self._pair_tile
        if tp_cap is None:
            tp_cap = 1024 if self._vmem_limit >= 80 * 1024 * 1024 else 512
        TP = min(tp_cap, _round_up(max(P, 1), 128))
        P_pad = _round_up(max(P, 1), TP)
        K = P_pad // TP
        L = self.n_interactions
        Fp = self._Fp

        # Host-side cosine cutoff (mirrors _distance_to_radial_basis); padded
        # pairs get rcut == 0 -> exact zero contribution (their index is 0).
        rcut = 0.5 * (jnp.cos(d_ij * (math.pi / self.cutoff)) + 1.0)
        rcut = rcut * (d_ij < self.cutoff).astype(jnp.float32)

        d_col = jnp.full((P_pad, 1), self.cutoff, jnp.float32).at[:P, 0].set(d_ij)
        rc_col = jnp.zeros((P_pad, 1), jnp.float32).at[:P, 0].set(rcut)
        # NOTE: pair indices are assumed to lie in [0, B*A); out-of-range
        # indices would silently read bias-contaminated padded rows.
        ii_p = jnp.zeros((P_pad,), jnp.int32).at[:P].set(idx_i)
        ij_p = jnp.zeros((P_pad,), jnp.int32).at[:P].set(idx_j)

        # Zero-padded flat atom features (padded rows are never gathered).
        x_flat = jnp.zeros((N_pad, C), jnp.float32)
        x_flat = x_flat.at[:N].set(x.reshape(N, C).astype(jnp.float32))

        kern = partial(_schnet_kernel, coeff=self.coeff,
                       rbf_width=self.rbf_width)
        out = pl.pallas_call(
            kern,
            out_shape=jax.ShapeDtypeStruct((N_pad, C), jnp.float32),
            grid_spec=pltpu.PrefetchScalarGridSpec(
                num_scalar_prefetch=2,            # idx_i, idx_j -> SMEM
                grid=(L, K),
                in_specs=[
                    pl.BlockSpec(memory_space=pl.ANY),                       # x0 (HBM)
                    pl.BlockSpec((TP, 1), lambda l, k, *_: (k, 0)),          # d_ij
                    pl.BlockSpec((TP, 1), lambda l, k, *_: (k, 0)),          # rcut_ij
                    pl.BlockSpec((None, C, Fp), lambda l, k, *_: (l, 0, 0)),       # W_in
                    pl.BlockSpec((None, 1, Fp), lambda l, k, *_: (l, 0, 0)),       # b_in
                    pl.BlockSpec((None, RBF_PAD, Fp), lambda l, k, *_: (l, 0, 0)), # W_f
                    pl.BlockSpec((None, 1, Fp), lambda l, k, *_: (l, 0, 0)),       # b_f
                    pl.BlockSpec((None, Fp, C), lambda l, k, *_: (l, 0, 0)),       # W_out
                    pl.BlockSpec((None, 1, C), lambda l, k, *_: (l, 0, 0)),        # b_out
                ],
                out_specs=pl.BlockSpec((N_pad, C), lambda l, k, *_: (0, 0)),
                scratch_shapes=[
                    pltpu.VMEM((N_pad, C), jnp.float32),    # resident x (residual)
                    pltpu.VMEM((N_pad, Fp), jnp.float32),   # h = x @ W_in + b_in
                    pltpu.VMEM((TP, Fp), jnp.float32),      # per-tile filter weights
                    pltpu.VMEM((N_pad, Fp), jnp.float32),   # scatter accumulator
                    pltpu.SemaphoreType.DMA,                # x0 -> x_s copy
                ],
            ),
            compiler_params=pltpu.CompilerParams(
                # Layer axis carries x_s, pair axis carries acc_s -> both
                # sequential.  (v7x dual-TC split: see TODO in the header.)
                dimension_semantics=("arbitrary", "arbitrary"),
                vmem_limit_bytes=self._vmem_limit,
            ),
        )(ii_p, ij_p, x_flat, d_col, rc_col,
          self._win, self._bin, self._wf, self._bf, self._wout, self._bout)

        return out[:N].reshape(B, A, C)


# ---------------------------------------------------------------------------
# Pure-JAX f32 reference (mirrors the PyTorch forward semantics)
# ---------------------------------------------------------------------------
def reference_forward(model, x, pairlist):
    atom_index12 = pairlist["atom_index12"]
    d_ij = pairlist["d_ij"].astype(jnp.float32)
    offsets = model.offsets
    f_ij = jnp.exp(model.coeff * (d_ij[:, None] - offsets[None, :]) ** 2)
    rcut = 0.5 * (jnp.cos(d_ij * jnp.pi / model.cutoff) + 1.0)
    rcut = rcut * (d_ij < model.cutoff).astype(jnp.float32)
    idx_i, idx_j = atom_index12[0], atom_index12[1]
    B, A, C = x.shape
    for (w_in, b_in, w_f, b_f, w_out, b_out) in model.params:
        h = x.reshape(B * A, C) @ w_in + b_in
        w = _shifted_softplus(f_ij @ w_f + b_f) * rcut[:, None]
        x_ij = h[idx_j] * w
        scat = jax.ops.segment_sum(x_ij, idx_i, num_segments=B * A)
        v = _shifted_softplus(scat @ w_out + b_out)
        x = x + v.reshape(B, A, C)
    return x


if __name__ == "__main__":
    key = jax.random.PRNGKey(0)
    B, A, C = 2, 8, 128        # batch, atoms, n_atom_basis (128 is hard-coded)
    F, R, P = 64, 20, 32       # n_filters, n_rbf, n_pairs
    n_interactions = 2
    cutoff = 5.0

    k_x, k_idx, k_d, k_par = jax.random.split(key, 4)
    x = jax.random.normal(k_x, (B, A, C), jnp.float32)
    atom_index12 = jax.random.randint(k_idx, (2, P), 0, B * A, dtype=jnp.int32)
    d_ij = jax.random.uniform(k_d, (P,), jnp.float32, 0.5, 6.0)
    pairlist = {"atom_index12": atom_index12, "d_ij": d_ij}

    model = SchNetRepresentationPallas(C, F, n_interactions, cutoff=cutoff,
                                       key=k_par)

    out = model(x, pairlist)
    out = jax.block_until_ready(out)

    ref = reference_forward(model, x, pairlist)
    assert out.shape == (B, A, C)
    max_err = float(jnp.max(jnp.abs(out - ref)))
    # bf16 MXU operands with f32 accumulation -> loose tolerance vs f32 ref.
    assert jnp.allclose(out, ref, rtol=5e-2, atol=5e-2), (
        f"mismatch vs reference (max abs err {max_err})")

    print("KERNEL_OK")
</pallas_src>

<mosaic_0001>
module attributes {stable_mosaic.version = 11 : i64} {
  func.func @_schnet_kernel(%arg0: i32, %arg1: i32, %arg2: memref<128xi32, #tpu.memory_space<smem>>, %arg3: memref<128xi32, #tpu.memory_space<smem>>, %arg4: memref<16x128xf32, #tpu.memory_space<any>>, %arg5: memref<128x1xf32, #tpu.memory_space<vmem>>, %arg6: memref<128x1xf32, #tpu.memory_space<vmem>>, %arg7: memref<1x128x128xbf16, #tpu.memory_space<vmem>>, %arg8: memref<1x1x128xf32, #tpu.memory_space<vmem>>, %arg9: memref<1x128x128xbf16, #tpu.memory_space<vmem>>, %arg10: memref<1x1x128xf32, #tpu.memory_space<vmem>>, %arg11: memref<1x128x128xbf16, #tpu.memory_space<vmem>>, %arg12: memref<1x1x128xf32, #tpu.memory_space<vmem>>, %arg13: memref<16x128xf32, #tpu.memory_space<vmem>>, %arg14: memref<16x128xf32, #tpu.memory_space<vmem>>, %arg15: memref<16x128xf32, #tpu.memory_space<vmem>>, %arg16: memref<128x128xf32, #tpu.memory_space<vmem>>, %arg17: memref<16x128xf32, #tpu.memory_space<vmem>>, %arg18: memref<!tpu.dma_semaphore, #tpu.memory_space<semaphore_mem>>) attributes {dimension_semantics = [#tpu.dimension_semantics<arbitrary>, #tpu.dimension_semantics<arbitrary>], iteration_bounds = array<i64: 2, 1>, scalar_prefetch = 2 : i64, scratch_operands = 5 : i64, tpu.core_type = #tpu.core_type<tc>, window_params = [{}, {transform_indices = @transform_1, window_bounds = array<i64: 128, 1>}, {transform_indices = @transform_2, window_bounds = array<i64: 128, 1>}, {transform_indices = @transform_3, window_bounds = array<i64: 1, 128, 128>}, {transform_indices = @transform_4, window_bounds = array<i64: 1, 1, 128>}, {transform_indices = @transform_5, window_bounds = array<i64: 1, 128, 128>}, {transform_indices = @transform_6, window_bounds = array<i64: 1, 1, 128>}, {transform_indices = @transform_7, window_bounds = array<i64: 1, 128, 128>}, {transform_indices = @transform_8, window_bounds = array<i64: 1, 1, 128>}, {pipeline_mode = #tpu.pipeline_mode<synchronous>, transform_indices = @transform_9, window_bounds = array<i64: 16, 128>}]} {
    %c0_i32 = arith.constant 0 : i32
    %0 = arith.cmpi eq, %arg1, %c0_i32 : i32
    %1 = arith.extui %0 : i1 to i32
    %c0_i32_0 = arith.constant 0 : i32
    %2 = arith.cmpi ne, %1, %c0_i32_0 : i32
    scf.if %2 {
      %c0_i32_22 = arith.constant 0 : i32
      %43 = arith.cmpi eq, %arg0, %c0_i32_22 : i32
      %44 = arith.extui %43 : i1 to i32
      %c0_i32_23 = arith.constant 0 : i32
      %45 = arith.cmpi ne, %44, %c0_i32_23 : i32
      scf.if %45 {
        tpu.enqueue_dma source(%arg4 : memref<16x128xf32, #tpu.memory_space<any>>) target(%arg14 : memref<16x128xf32, #tpu.memory_space<vmem>>) target_semaphore(%arg18 : memref<!tpu.dma_semaphore, #tpu.memory_space<semaphore_mem>>)
        tpu.wait_dma2 semaphore(%arg18 : memref<!tpu.dma_semaphore, #tpu.memory_space<semaphore_mem>>) src(%arg4 : memref<16x128xf32, #tpu.memory_space<any>>) dst(%arg14 : memref<16x128xf32, #tpu.memory_space<vmem>>)
      } else {
      }
      %c0_24 = arith.constant 0 : index
      %c0_25 = arith.constant 0 : index
      %46 = vector.load %arg14[%c0_24, %c0_25] : memref<16x128xf32, #tpu.memory_space<vmem>>, vector<16x128xf32>
      %47 = arith.truncf %46 : vector<16x128xf32> to vector<16x128xbf16>
      %c0_26 = arith.constant 0 : index
      %c0_27 = arith.constant 0 : index
      %c0_28 = arith.constant 0 : index
      %48 = vector.load %arg7[%c0_26, %c0_27, %c0_28] : memref<1x128x128xbf16, #tpu.memory_space<vmem>>, vector<1x128x128xbf16>
      %49 = vector.shape_cast %48 : vector<1x128x128xbf16> to vector<128x128xbf16>
      %cst_29 = arith.constant dense<0.000000e+00> : vector<16x128xf32>
      %50 = tpu.matmul %47, %49, %cst_29 {dimension_numbers = #tpu.dot_dimension_numbers<[1], [0], [0], [1], [0, 0, 1, 1], [], []>} : vector<16x128xbf16>, vector<128x128xbf16>, vector<16x128xf32> -> vector<16x128xf32>
      %c0_30 = arith.constant 0 : index
      %c0_31 = arith.constant 0 : index
      %c0_32 = arith.constant 0 : index
      %51 = vector.load %arg8[%c0_30, %c0_31, %c0_32] : memref<1x1x128xf32, #tpu.memory_space<vmem>>, vector<1x1x128xf32>
      %52 = vector.shape_cast %51 : vector<1x1x128xf32> to vector<1x128xf32>
      %53 = vector.broadcast %52 : vector<1x128xf32> to vector<16x128xf32>
      %54 = arith.addf %50, %53 : vector<16x128xf32>
      %c0_33 = arith.constant 0 : index
      %c0_34 = arith.constant 0 : index
      %55 = vector.load %arg15[%c0_33, %c0_34] : memref<16x128xf32, #tpu.memory_space<vmem>>, vector<16x128xf32>
      tpu.vector_store %arg15[%c0_33, %c0_34], %54 {strides = array<i32>} : memref<16x128xf32, #tpu.memory_space<vmem>>, vector<16x128xf32>,
      %cst_35 = arith.constant 0.000000e+00 : f32
      %56 = vector.broadcast %cst_35 : f32 to vector<16x128xf32>
      %c0_36 = arith.constant 0 : index
      %c0_37 = arith.constant 0 : index
      %57 = vector.load %arg17[%c0_36, %c0_37] : memref<16x128xf32, #tpu.memory_space<vmem>>, vector<16x128xf32>
      tpu.vector_store %arg17[%c0_36, %c0_37], %56 {strides = array<i32>} : memref<16x128xf32, #tpu.memory_space<vmem>>, vector<16x128xf32>,
    } else {
    }
    %c0 = arith.constant 0 : index
    %c0_1 = arith.constant 0 : index
    %3 = vector.load %arg5[%c0, %c0_1] : memref<128x1xf32, #tpu.memory_space<vmem>>, vector<128x1xf32>
    %4 = tpu.iota {dimensions = array<i32: 1>} : vector<128x128xi32>
    %5 = arith.sitofp %4 : vector<128x128xi32> to vector<128x128xf32>
    %cst = arith.constant 0.263157904 : f32
    %6 = vector.broadcast %cst : f32 to vector<128x128xf32>
    %7 = arith.mulf %5, %6 : vector<128x128xf32>
    %8 = vector.broadcast %3 : vector<128x1xf32> to vector<128x128xf32>
    %9 = arith.subf %8, %7 : vector<128x128xf32>
    %cst_2 = arith.constant -7.21999931 : f32
    %10 = vector.broadcast %cst_2 : f32 to vector<128x128xf32>
    %11 = arith.mulf %10, %9 : vector<128x128xf32>
    %12 = arith.mulf %11, %9 : vector<128x128xf32>
    %13 = math.exp %12 : vector<128x128xf32>
    %14 = arith.truncf %13 : vector<128x128xf32> to vector<128x128xbf16>
    %c0_3 = arith.constant 0 : index
    %c0_4 = arith.constant 0 : index
    %c0_5 = arith.constant 0 : index
    %15 = vector.load %arg9[%c0_3, %c0_4, %c0_5] : memref<1x128x128xbf16, #tpu.memory_space<vmem>>, vector<1x128x128xbf16>
    %16 = vector.shape_cast %15 : vector<1x128x128xbf16> to vector<128x128xbf16>
    %cst_6 = arith.constant dense<0.000000e+00> : vector<128x128xf32>
    %17 = tpu.matmul %14, %16, %cst_6 {dimension_numbers = #tpu.dot_dimension_numbers<[1], [0], [0], [1], [0, 0, 1, 1], [], []>} : vector<128x128xbf16>, vector<128x128xbf16>, vector<128x128xf32> -> vector<128x128xf32>
    %c0_7 = arith.constant 0 : index
    %c0_8 = arith.constant 0 : index
    %c0_9 = arith.constant 0 : index
    %18 = vector.load %arg10[%c0_7, %c0_8, %c0_9] : memref<1x1x128xf32, #tpu.memory_space<vmem>>, vector<1x1x128xf32>
    %19 = vector.shape_cast %18 : vector<1x1x128xf32> to vector<1x128xf32>
    %20 = vector.broadcast %19 : vector<1x128xf32> to vector<128x128xf32>
    %21 = arith.addf %17, %20 : vector<128x128xf32>
    %cst_10 = arith.constant 0.000000e+00 : f32
    %22 = vector.broadcast %cst_10 : f32 to vector<128x128xf32>
    %23 = arith.maximumf %21, %22 : vector<128x128xf32>
    %24 = math.absf %21 : vector<128x128xf32>
    %cst_11 = arith.constant 0.000000e+00 : f32
    %25 = vector.broadcast %cst_11 : f32 to vector<128x128xf32>
    %26 = arith.subf %25, %24 : vector<128x128xf32>
    %27 = math.exp %26 : vector<128x128xf32>
    %cst_12 = arith.constant 1.000000e+00 : f32
    %28 = vector.broadcast %cst_12 : f32 to vector<128x128xf32>
    %29 = arith.addf %28, %27 : vector<128x128xf32>
    %30 = math.log %29 : vector<128x128xf32>
    %31 = arith.addf %23, %30 : vector<128x128xf32>
    %cst_13 = arith.constant 0.693147182 : f32
    %32 = vector.broadcast %cst_13 : f32 to vector<128x128xf32>
    %33 = arith.subf %31, %32 : vector<128x128xf32>
    %c0_14 = arith.constant 0 : index
    %c0_15 = arith.constant 0 : index
    %34 = vector.load %arg6[%c0_14, %c0_15] : memref<128x1xf32, #tpu.memory_space<vmem>>, vector<128x1xf32>
    %35 = vector.broadcast %34 : vector<128x1xf32> to vector<128x128xf32>
    %36 = arith.mulf %33, %35 : vector<128x128xf32>
    %c0_16 = arith.constant 0 : index
    %c0_17 = arith.constant 0 : index
    %37 = vector.load %arg16[%c0_16, %c0_17] : memref<128x128xf32, #tpu.memory_space<vmem>>, vector<128x128xf32>
    tpu.vector_store %arg16[%c0_16, %c0_17], %36 {strides = array<i32>} : memref<128x128xf32, #tpu.memory_space<vmem>>, vector<128x128xf32>,
    %c128_i32 = arith.constant 128 : i32
    %38 = arith.muli %arg1, %c128_i32 : i32
    %c0_i32_18 = arith.constant 0 : i32
    %c32_i32 = arith.constant 32 : i32
    %39 = arith.addi %c0_i32_18, %c32_i32 : i32
    %c1_i32 = arith.constant 1 : i32
    scf.for %arg19 = %c0_i32_18 to %39 step %c1_i32  : i32 {
      %c4_i32 = arith.constant 4 : i32
      %43 = arith.muli %arg19, %c4_i32 : i32
      %c0_i32_22 = arith.constant 0 : i32
      %44 = arith.addi %43, %c0_i32_22 : i32
      %45 = arith.addi %38, %44 : i32
      %46 = arith.index_cast %45 : i32 to index
      %47 = memref.load %arg3[%46] : memref<128xi32, #tpu.memory_space<smem>>
      %48 = arith.index_cast %45 : i32 to index
      %49 = memref.load %arg2[%48] : memref<128xi32, #tpu.memory_space<smem>>
      %50 = arith.index_cast %47 : i32 to index
      %c0_23 = arith.constant 0 : index
      %51 = vector.load %arg15[%50, %c0_23] : memref<16x128xf32, #tpu.memory_space<vmem>>, vector<1x128xf32>
      %52 = arith.index_cast %44 : i32 to index
      %c0_24 = arith.constant 0 : index
      %53 = vector.load %arg16[%52, %c0_24] : memref<128x128xf32, #tpu.memory_space<vmem>>, vector<1x128xf32>
      %54 = arith.mulf %51, %53 : vector<1x128xf32>
      %55 = arith.index_cast %49 : i32 to index
      %c0_25 = arith.constant 0 : index
      %56 = vector.load %arg17[%55, %c0_25] : memref<16x128xf32, #tpu.memory_space<vmem>>, vector<1x128xf32>
      %57 = arith.addf %56, %54 : vector<1x128xf32>
      %58 = arith.index_cast %49 : i32 to index
      %c0_26 = arith.constant 0 : index
      %59 = vector.load %arg17[%58, %c0_26] : memref<16x128xf32, #tpu.memory_space<vmem>>, vector<1x128xf32>
      tpu.vector_store %arg17[%58, %c0_26], %57 {strides = array<i32>} : memref<16x128xf32, #tpu.memory_space<vmem>>, vector<1x128xf32>,
      %c4_i32_27 = arith.constant 4 : i32
      %60 = arith.muli %arg19, %c4_i32_27 : i32
      %c1_i32_28 = arith.constant 1 : i32
      %61 = arith.addi %60, %c1_i32_28 : i32
      %62 = arith.addi %38, %61 : i32
      %63 = arith.index_cast %62 : i32 to index
      %64 = memref.load %arg3[%63] : memref<128xi32, #tpu.memory_space<smem>>
      %65 = arith.index_cast %62 : i32 to index
      %66 = memref.load %arg2[%65] : memref<128xi32, #tpu.memory_space<smem>>
      %67 = arith.index_cast %64 : i32 to index
      %c0_29 = arith.constant 0 : index
      %68 = vector.load %arg15[%67, %c0_29] : memref<16x128xf32, #tpu.memory_space<vmem>>, vector<1x128xf32>
      %69 = arith.index_cast %61 : i32 to index
      %c0_30 = arith.constant 0 : index
      %70 = vector.load %arg16[%69, %c0_30] : memref<128x128xf32, #tpu.memory_space<vmem>>, vector<1x128xf32>
      %71 = arith.mulf %68, %70 : vector<1x128xf32>
      %72 = arith.index_cast %66 : i32 to index
      %c0_31 = arith.constant 0 : index
      %73 = vector.load %arg17[%72, %c0_31] : memref<16x128xf32, #tpu.memory_space<vmem>>, vector<1x128xf32>
      %74 = arith.addf %73, %71 : vector<1x128xf32>
      %75 = arith.index_cast %66 : i32 to index
      %c0_32 = arith.constant 0 : index
      %76 = vector.load %arg17[%75, %c0_32] : memref<16x128xf32, #tpu.memory_space<vmem>>, vector<1x128xf32>
      tpu.vector_store %arg17[%75, %c0_32], %74 {strides = array<i32>} : memref<16x128xf32, #tpu.memory_space<vmem>>, vector<1x128xf32>,
      %c4_i32_33 = arith.constant 4 : i32
      %77 = arith.muli %arg19, %c4_i32_33 : i32
      %c2_i32 = arith.constant 2 : i32
      %78 = arith.addi %77, %c2_i32 : i32
      %79 = arith.addi %38, %78 : i32
      %80 = arith.index_cast %79 : i32 to index
      %81 = memref.load %arg3[%80] : memref<128xi32, #tpu.memory_space<smem>>
      %82 = arith.index_cast %79 : i32 to index
      %83 = memref.load %arg2[%82] : memref<128xi32, #tpu.memory_space<smem>>
      %84 = arith.index_cast %81 : i32 to index
      %c0_34 = arith.constant 0 : index
      %85 = vector.load %arg15[%84, %c0_34] : memref<16x128xf32, #tpu.memory_space<vmem>>, vector<1x128xf32>
      %86 = arith.index_cast %78 : i32 to index
      %c0_35 = arith.constant 0 : index
      %87 = vector.load %arg16[%86, %c0_35] : memref<128x128xf32, #tpu.memory_space<vmem>>, vector<1x128xf32>
      %88 = arith.mulf %85, %87 : vector<1x128xf32>
      %89 = arith.index_cast %83 : i32 to index
      %c0_36 = arith.constant 0 : index
      %90 = vector.load %arg17[%89, %c0_36] : memref<16x128xf32, #tpu.memory_space<vmem>>, vector<1x128xf32>
      %91 = arith.addf %90, %88 : vector<1x128xf32>
      %92 = arith.index_cast %83 : i32 to index
      %c0_37 = arith.constant 0 : index
      %93 = vector.load %arg17[%92, %c0_37] : memref<16x128xf32, #tpu.memory_space<vmem>>, vector<1x128xf32>
      tpu.vector_store %arg17[%92, %c0_37], %91 {strides = array<i32>} : memref<16x128xf32, #tpu.memory_space<vmem>>, vector<1x128xf32>,
      %c4_i32_38 = arith.constant 4 : i32
      %94 = arith.muli %arg19, %c4_i32_38 : i32
      %c3_i32 = arith.constant 3 : i32
      %95 = arith.addi %94, %c3_i32 : i32
      %96 = arith.addi %38, %95 : i32
      %97 = arith.index_cast %96 : i32 to index
      %98 = memref.load %arg3[%97] : memref<128xi32, #tpu.memory_space<smem>>
      %99 = arith.index_cast %96 : i32 to index
      %100 = memref.load %arg2[%99] : memref<128xi32, #tpu.memory_space<smem>>
      %101 = arith.index_cast %98 : i32 to index
      %c0_39 = arith.constant 0 : index
      %102 = vector.load %arg15[%101, %c0_39] : memref<16x128xf32, #tpu.memory_space<vmem>>, vector<1x128xf32>
      %103 = arith.index_cast %95 : i32 to index
      %c0_40 = arith.constant 0 : index
      %104 = vector.load %arg16[%103, %c0_40] : memref<128x128xf32, #tpu.memory_space<vmem>>, vector<1x128xf32>
      %105 = arith.mulf %102, %104 : vector<1x128xf32>
      %106 = arith.index_cast %100 : i32 to index
      %c0_41 = arith.constant 0 : index
      %107 = vector.load %arg17[%106, %c0_41] : memref<16x128xf32, #tpu.memory_space<vmem>>, vector<1x128xf32>
      %108 = arith.addf %107, %105 : vector<1x128xf32>
      %109 = arith.index_cast %100 : i32 to index
      %c0_42 = arith.constant 0 : index
      %110 = vector.load %arg17[%109, %c0_42] : memref<16x128xf32, #tpu.memory_space<vmem>>, vector<1x128xf32>
      tpu.vector_store %arg17[%109, %c0_42], %108 {strides = array<i32>} : memref<16x128xf32, #tpu.memory_space<vmem>>, vector<1x128xf32>,
    }
    %c32_i32_19 = arith.constant 32 : i32
    %c0_i32_20 = arith.constant 0 : i32
    %40 = arith.cmpi eq, %arg1, %c0_i32_20 : i32
    %41 = arith.extui %40 : i1 to i32
    %c0_i32_21 = arith.constant 0 : i32
    %42 = arith.cmpi ne, %41, %c0_i32_21 : i32
    scf.if %42 {
      %c0_22 = arith.constant 0 : index
      %c0_23 = arith.constant 0 : index
      %43 = vector.load %arg17[%c0_22, %c0_23] : memref<16x128xf32, #tpu.memory_space<vmem>>, vector<16x128xf32>
      %44 = arith.truncf %43 : vector<16x128xf32> to vector<16x128xbf16>
      %c0_24 = arith.constant 0 : index
      %c0_25 = arith.constant 0 : index
      %c0_26 = arith.constant 0 : index
      %45 = vector.load %arg11[%c0_24, %c0_25, %c0_26] : memref<1x128x128xbf16, #tpu.memory_space<vmem>>, vector<1x128x128xbf16>
      %46 = vector.shape_cast %45 : vector<1x128x128xbf16> to vector<128x128xbf16>
      %cst_27 = arith.constant dense<0.000000e+00> : vector<16x128xf32>
      %47 = tpu.matmul %44, %46, %cst_27 {dimension_numbers = #tpu.dot_dimension_numbers<[1], [0], [0], [1], [0, 0, 1, 1], [], []>} : vector<16x128xbf16>, vector<128x128xbf16>, vector<16x128xf32> -> vector<16x128xf32>
      %c0_28 = arith.constant 0 : index
      %c0_29 = arith.constant 0 : index
      %c0_30 = arith.constant 0 : index
      %48 = vector.load %arg12[%c0_28, %c0_29, %c0_30] : memref<1x1x128xf32, #tpu.memory_space<vmem>>, vector<1x1x128xf32>
      %49 = vector.shape_cast %48 : vector<1x1x128xf32> to vector<1x128xf32>
      %50 = vector.broadcast %49 : vector<1x128xf32> to vector<16x128xf32>
      %51 = arith.addf %47, %50 : vector<16x128xf32>
      %c0_31 = arith.constant 0 : index
      %c0_32 = arith.constant 0 : index
      %52 = vector.load %arg14[%c0_31, %c0_32] : memref<16x128xf32, #tpu.memory_space<vmem>>, vector<16x128xf32>
      %cst_33 = arith.constant 0.000000e+00 : f32
      %53 = vector.broadcast %cst_33 : f32 to vector<16x128xf32>
      %54 = arith.maximumf %51, %53 : vector<16x128xf32>
      %55 = math.absf %51 : vector<16x128xf32>
      %cst_34 = arith.constant 0.000000e+00 : f32
      %56 = vector.broadcast %cst_34 : f32 to vector<16x128xf32>
      %57 = arith.subf %56, %55 : vector<16x128xf32>
      %58 = math.exp %57 : vector<16x128xf32>
      %cst_35 = arith.constant 1.000000e+00 : f32
      %59 = vector.broadcast %cst_35 : f32 to vector<16x128xf32>
      %60 = arith.addf %59, %58 : vector<16x128xf32>
      %61 = math.log %60 : vector<16x128xf32>
      %62 = arith.addf %54, %61 : vector<16x128xf32>
      %cst_36 = arith.constant 0.693147182 : f32
      %63 = vector.broadcast %cst_36 : f32 to vector<16x128xf32>
      %64 = arith.subf %62, %63 : vector<16x128xf32>
      %65 = arith.addf %52, %64 : vector<16x128xf32>
      %c0_37 = arith.constant 0 : index
      %c0_38 = arith.constant 0 : index
      %66 = vector.load %arg14[%c0_37, %c0_38] : memref<16x128xf32, #tpu.memory_space<vmem>>, vector<16x128xf32>
      tpu.vector_store %arg14[%c0_37, %c0_38], %65 {strides = array<i32>} : memref<16x128xf32, #tpu.memory_space<vmem>>, vector<16x128xf32>,
      %c1_i32_39 = arith.constant 1 : i32
      %67 = arith.cmpi eq, %arg0, %c1_i32_39 : i32
      %68 = arith.extui %67 : i1 to i32
      %c0_i32_40 = arith.constant 0 : i32
      %69 = arith.cmpi ne, %68, %c0_i32_40 : i32
      scf.if %69 {
        %c0_41 = arith.constant 0 : index
        %c0_42 = arith.constant 0 : index
        %70 = vector.load %arg14[%c0_41, %c0_42] : memref<16x128xf32, #tpu.memory_space<vmem>>, vector<16x128xf32>
        %c0_43 = arith.constant 0 : index
        %c0_44 = arith.constant 0 : index
        %71 = vector.load %arg13[%c0_43, %c0_44] : memref<16x128xf32, #tpu.memory_space<vmem>>, vector<16x128xf32>
        tpu.vector_store %arg13[%c0_43, %c0_44], %70 {strides = array<i32>} : memref<16x128xf32, #tpu.memory_space<vmem>>, vector<16x128xf32>,
      } else {
      }
    } else {
    }
    return
  }
  func.func @transform_1(%arg0: i32, %arg1: i32, %arg2: memref<128xi32, #tpu.memory_space<smem>>, %arg3: memref<128xi32, #tpu.memory_space<smem>>) -> (i32, i32) {
    %c0_i32 = arith.constant 0 : i32
    %c0_i32_0 = arith.constant 0 : i32
    return %arg1, %c0_i32 : i32, i32
  }
  func.func @transform_2(%arg0: i32, %arg1: i32, %arg2: memref<128xi32, #tpu.memory_space<smem>>, %arg3: memref<128xi32, #tpu.memory_space<smem>>) -> (i32, i32) {
    %c0_i32 = arith.constant 0 : i32
    %c0_i32_0 = arith.constant 0 : i32
    return %arg1, %c0_i32 : i32, i32
  }
  func.func @transform_3(%arg0: i32, %arg1: i32, %arg2: memref<128xi32, #tpu.memory_space<smem>>, %arg3: memref<128xi32, #tpu.memory_space<smem>>) -> (i32, i32, i32) {
    %c0_i32 = arith.constant 0 : i32
    %c0_i32_0 = arith.constant 0 : i32
    %c0_i32_1 = arith.constant 0 : i32
    return %arg0, %c0_i32, %c0_i32_0 : i32, i32, i32
  }
  func.func @transform_4(%arg0: i32, %arg1: i32, %arg2: memref<128xi32, #tpu.memory_space<smem>>, %arg3: memref<128xi32, #tpu.memory_space<smem>>) -> (i32, i32, i32) {
    %c0_i32 = arith.constant 0 : i32
    %c0_i32_0 = arith.constant 0 : i32
    %c0_i32_1 = arith.constant 0 : i32
    return %arg0, %c0_i32, %c0_i32_0 : i32, i32, i32
  }
  func.func @transform_5(%arg0: i32, %arg1: i32, %arg2: memref<128xi32, #tpu.memory_space<smem>>, %arg3: memref<128xi32, #tpu.memory_space<smem>>) -> (i32, i32, i32) {
    %c0_i32 = arith.constant 0 : i32
    %c0_i32_0 = arith.constant 0 : i32
    %c0_i32_1 = arith.constant 0 : i32
    return %arg0, %c0_i32, %c0_i32_0 : i32, i32, i32
  }
  func.func @transform_6(%arg0: i32, %arg1: i32, %arg2: memref<128xi32, #tpu.memory_space<smem>>, %arg3: memref<128xi32, #tpu.memory_space<smem>>) -> (i32, i32, i32) {
    %c0_i32 = arith.constant 0 : i32
    %c0_i32_0 = arith.constant 0 : i32
    %c0_i32_1 = arith.constant 0 : i32
    return %arg0, %c0_i32, %c0_i32_0 : i32, i32, i32
  }
  func.func @transform_7(%arg0: i32, %arg1: i32, %arg2: memref<128xi32, #tpu.memory_space<smem>>, %arg3: memref<128xi32, #tpu.memory_space<smem>>) -> (i32, i32, i32) {
    %c0_i32 = arith.constant 0 : i32
    %c0_i32_0 = arith.constant 0 : i32
    %c0_i32_1 = arith.constant 0 : i32
    return %arg0, %c0_i32, %c0_i32_0 : i32, i32, i32
  }
  func.func @transform_8(%arg0: i32, %arg1: i32, %arg2: memref<128xi32, #tpu.memory_space<smem>>, %arg3: memref<128xi32, #tpu.memory_space<smem>>) -> (i32, i32, i32) {
    %c0_i32 = arith.constant 0 : i32
    %c0_i32_0 = arith.constant 0 : i32
    %c0_i32_1 = arith.constant 0 : i32
    return %arg0, %c0_i32, %c0_i32_0 : i32, i32, i32
  }
  func.func @transform_9(%arg0: i32, %arg1: i32, %arg2: memref<128xi32, #tpu.memory_space<smem>>, %arg3: memref<128xi32, #tpu.memory_space<smem>>) -> (i32, i32) {
    %c0_i32 = arith.constant 0 : i32
    %c0_i32_0 = arith.constant 0 : i32
    %c0_i32_1 = arith.constant 0 : i32
    return %c0_i32, %c0_i32_0 : i32, i32
  }
}

</mosaic_0001>

<bundles_post_ra>
// kernel: tpu_custom_call.1
= control target key start
LH: loop header
LB: loop body
LE: loop exit
PB: predicated region body
PF: predicated region fallthrough
CT: control target
= control target key end

     0   :  { %s2094_s23 = smov [#allocation8]   ;;  %s2095_s24 = smov [#allocation9]   ;;  %s2588_s0 = inlined_call_operand.vmem [shape: s32[128], index: 0, kind: input, shape index: {}]   ;;  %s2589_s2 = inlined_call_operand.hbm [shape: f32[16,128], index: 2, kind: input, shape index: {}]   ;;  %s2590_s3 = inlined_call_operand.vmem [shape: f32[128,1], index: 3, kind: input, shape index: {}]   ;;  %s2591_s4 = inlined_call_operand.vmem [shape: f32[128,1], index: 4, kind: input, shape index: {}]   ;;  %s2592_s5 = inlined_call_operand.vmem [shape: bf16[2,128,128], index: 5, kind: input, shape index: {}]   ;;  %s2593_s6 = inlined_call_operand.vmem [shape: f32[2,1,128], index: 6, kind: input, shape index: {}]   ;;  %s2594_s7 = inlined_call_operand.vmem [shape: bf16[2,128,128], index: 7, kind: input, shape index: {}]   ;;  %s2595_s8 = inlined_call_operand.vmem [shape: f32[2,1,128], index: 8, kind: input, shape index: {}]   ;;  %s2596_s9 = inlined_call_operand.hbm [shape: bf16[2,128,128], index: 9, kind: input, shape index: {}]   ;;  %s2597_s10 = inlined_call_operand.vmem [shape: f32[2,1,128], index: 10, kind: input, shape index: {}]   ;;  %s2598_s11 = inlined_call_operand.hbm [shape: f32[16,128], index: 11, kind: output, shape index: {}]   ;;  %s2599_s1 = inlined_call_operand.hbm [shape: s32[128], index: 1, kind: input, shape index: {}]  }
   0x1   :  { %2603 = sst [smem:[#allocation25_spill]] %s2589_s2  ;;  %s17_s19 = sshll.u32 %s2588_s0, 4  ;;  %s18_s19 = int_to_ptr.vmem [resolvable:$true] %s17_s19 }
   0x2   :  { %2604 = sst [smem:[#allocation26_spill]] %s2596_s9  ;;  %s22_s22 = sshll.u32 %s2599_s1, 4  ;;  %s23_s22 = int_to_ptr.hbm [resolvable:$true] %s22_s22 }
   0x3   :  { %20 = dma.vmem_to_smem %s18_s19, 16, %s2094_s23, [#allocation7] }
   0x4   :  { %25 = dma.hbm_to_smem %s23_s22, 16, %s2095_s24, [#allocation7] }
   0x5   :  { %2052 = dma.done.wait [#allocation7], 32 }
   0x6   :  { %2053 = vsyncadd [#allocation7], 4294967264 }
   0x7   :  { %28 = sfence }
   0x8   :  { %29 = vsyncpa [#allocation11], 0 }
   0x9   :  { %31 = vsyncpa [#allocation11 + $0x1], 0 }
   0xa   :  { %32 = vsyncpa [#allocation12], 0  ;;  %s2170_s25 = smov 0   ;;  %s2172_s26 = smov 0  }
   0xb   :  { %s2174_s0 = smov 0   ;;  %s2176_s27 = smov 0  }
   0xc   :  { %s2178_s1 = smov 0   ;;  %s2180_s28 = smov 0  }
   0xd LB: > { %2605 = sst [smem:[#allocation22_spill]] %s2084_s1  ;;  %s2600_s29 = sadd.s32 4294967295, %s2088_s28   ;;  %s2088_s28 = sphi %s2180_s28, %s38_s28   ;;  %s2084_s1 = sphi %s2178_s1, %s2615_s1   ;;  %s2080_s27 = sphi %s2176_s27, %s2619_s27   ;;  %s2076_s0 = sphi %s2174_s0, %s2618_s0   ;;  %s2072_s26 = sphi %s2172_s26, %s2617_s26   ;;  %s2068_s25 = sphi %s2170_s25, %s2616_s25  }
   0xe   : > { %s50_s30 = sadd.s32 1, %s2084_s1  ;;  %s213_s12 = sadd.s32 1, %s2076_s0 }
   0xf   : > { %p52_p0 = scmp.ge.s32.totalorder %s50_s30, 2  ;;  %p220_p1 = scmp.ne.s32.totalorder %s2076_s0, %s2072_s26 }
  0x10   : > { %p221_p2 = scmp.eq.s32.totalorder %s2088_s28, 0  ;;  %p226_p4 = scmp.ne.s32.totalorder %s2072_s26, %s2068_s25 }
  0x11   : > { %s2621_s30 = smov (%p52_p0, %s50_s30), 0  ;;  %p227_p5 = scmp.eq.s32.totalorder %s2600_s29, 0 }
  0x12   : > { %2606 = sst [smem:[#allocation23_spill]] %s2621_s30  ;;  %p2206_p3 = por %p221_p2, %p220_p1 }
  0x13   : > { %s210_s14 = ssub.s32 %s2084_s1, %s2621_s30  ;;  %p2215_p7 = por %p227_p5, %p226_p4 }
  0x14   : > { %p211_p6 = scmp.eq.s32.totalorder %s210_s14, 0  ;;  %p1734_p8 = scmp.lt.s32.totalorder %s2088_s28, 2 }
  0x15   : > { %s343_s17 = sand.u32 1, %s2076_s0   ;;  %s1678_s18 = sshll.u32 %s2084_s1, 6 }
  0x16   : > { %s2221_s16 = scalar_select %p211_p6, %s2076_s0, %s213_s12  }
  0x17   : > { %s1541_s19 = sshll.u32 %s343_s17, 6  ;;  %s2610_s9 = sld [smem:[#allocation26_spill]] }
  0x18   : > { %2609 = sst [smem:[#allocation24_spill]] %s2221_s16  ;;  %s347_s24 = scalar_lea.vmem [#allocation10], %s1541_s19 }
  0x19   : > { %s355_s25 = sshll.u32 %s347_s24, 4  ;;  %p1731_p9 = pnand %p1734_p8, %p2206_p3  ;;  %s356_s25 = int_to_ptr.vmem [resolvable:$true] %s355_s25 }
  0x1a   : > { %p1544_p10 = scmp.ge.s32.totalorder %s2088_s28, 1  ;;  %p369_p11 = scmp.lt.s32.totalorder %s2088_s28, 3 }
  0x1b   : > { %s344_s14 = scalar_lea.sflag [#allocation11], %s343_s17  ;;  %s2096_s29 = smov 64  }
  0x1c   : > { %s2097_s12 = smov 4   ;;  %p370_p12 = pnand %p1544_p10, %p369_p11 }
  0x1d   : > { %s352_s22 = scalar_lea.hbm %s2610_s9, %s1678_s18  ;;  %s375_s30 = sand.u32 (!%p370_p12), 1, %s2072_s26  }
  0x1e   : > { %s353_s23 = sshll.u32 %s352_s22, 4  ;;  %373 = sbr.rel (%p370_p12) target bundleno = 636 (0x27c), region = 52  ;;  %s354_s23 = int_to_ptr.hbm [resolvable:$true] %s353_s23 }
  0x1f   : > { %1733 = dma.hbm_to_vmem [thread:$0]  (!%p1731_p9), %s354_s23, 1024, %s356_s25, %s344_s14, %s2096_s29, %s2096_s29, %s2097_s12  }
  0x20   : > { %s1545_s20 = sshll.u32 (!%p370_p12), %s375_s30, 6  ;;  %s376_s18 = scalar_lea.sflag (!%p370_p12), [#allocation11], %s375_s30 }
  0x21   : > { %s2233_s21 = scalar_lea.vmem (!%p370_p12), [#allocation10], %s1545_s20 }
  0x23   : > { %2055 = dma.done.wait (%p2215_p7), %s376_s18, 1024  }
  0x24   : > { %2057 = vsyncadd (%p2215_p7), %s376_s18, 4294966272  ;;  %p449_p13 = scmp.lt.s32.totalorder %s2080_s27, 1  ;;  %p1735_p0 = scmp.eq.s32.totalorder %s2080_s27, 0 }
  0x25   : > { %s2611_s2 = sld [smem:[#allocation25_spill]]  ;;  %s2098_s15 = smov [#allocation2]  }
  0x26   : > { %s2245_s19 = scalar_select %p449_p13, %s2080_s27, 1 }
  0x27   : > { %s485_s22 = sshll.u32 %s2098_s15, 4  ;;  %s486_s22 = int_to_ptr.vmem [resolvable:$true] %s485_s22 }
  0x28   : > { %s1679_s30 = sshll.u32 %s2245_s19, 6  ;;  %s456_s23 = scalar_lea.vmem %s2593_s6, %s2245_s19 }
  0x29   : > { %s2255_s14 = scalar_lea.vmem %s2592_s5, %s1679_s30  ;;  %s2260_s18 = scalar_lea.vmem %s2594_s7, %s1679_s30 }
  0x2a   : > { %s467_s16 = scalar_lea.vmem %s2597_s10, %s2245_s19 }
  0x2b   : > { %s483_s17 = sshll.u32 %s2611_s2, 4  ;;  %s464_s2 = scalar_lea.vmem %s2595_s8, %s2245_s19  ;;  %s484_s17 = int_to_ptr.hbm [resolvable:$true] %s483_s17 }
  0x2c   : > { %1724 = dma.hbm_to_vmem [thread:$0]  (%p1735_p0), %s484_s17, 256, %s486_s22, [#allocation6] }
  0x2d   : > { %2059 = dma.done.wait (%p1735_p0), [#allocation6], 256 }
  0x2e   : > { %2061 = vsyncadd (%p1735_p0), [#allocation6], 4294967040  ;;  %v2099_v0 = vmov 0.0   ;;  %v2100_v1 = vmov 0   ;;  %v593_v2 = vld [vmem:[%s2590_s3 + $0x60] sm:$0xff]  ;;  %v591_v3 = vld [vmem:[%s2590_s3 + $0x50] sm:$0xff]  ;;  %v597_v40 = vlaneseq }
  0x2f   : > { %579 = vst [vmem:[#allocation5] sm:$0xff] %v2099_v0  ;;  %1806 = vset.pattern.permute.xlu2 %v2100_v1  ;;  %1805 = vset.pattern.permute.xlu1 %v2100_v1  ;;  %v585_v4 = vld [vmem:[%s2590_s3 + $0x20] sm:$0xff]  ;;  %v594_v5 = vld [vmem:[%s2590_s3 + $0x68] sm:$0xff]  ;;  %v592_v6 = vld [vmem:[%s2590_s3 + $0x58] sm:$0xff] }
  0x30   : > { %580 = vst [vmem:[#allocation5 + $0x8] sm:$0xff] %v2099_v0  ;;  %1804 = vset.pattern.permute.xlu0 %v2100_v1  ;;  %663 = vperm.xlu2 %1806, %v593_v2   ;;  %v586_v7 = vld [vmem:[%s2590_s3 + $0x28] sm:$0xff]  ;;  %v587_v8 = vld [vmem:[%s2590_s3 + $0x30] sm:$0xff]  ;;  %v581_v9 = vld [vmem:[%s2590_s3] sm:$0xff]  ;;  %v598_v42 = vand.u32 127, %v597_v40 }
  0x31   : > { %653 = vperm.xlu0 %1804, %v591_v3   ;;  %623 = vperm.xlu1 %1805, %v585_v4   ;;  %v582_v10 = vld [vmem:[%s2590_s3 + $0x8] sm:$0xff]  ;;  %v596_v11 = vld [vmem:[%s2590_s3 + $0x78] sm:$0xff]  ;;  %v595_v13 = vld [vmem:[%s2590_s3 + $0x70] sm:$0xff] }
  0x32   : > { %v588_v12 = vld [vmem:[%s2590_s3 + $0x38] sm:$0xff]  ;;  %v589_v14 = vld [vmem:[%s2590_s3 + $0x40] sm:$0xff]  ;;  %v583_v15 = vld [vmem:[%s2590_s3 + $0x10] sm:$0xff]  ;;  %v599_v45 = vcvt.s32.f32 %v598_v42 }
  0x33   : > { %v584_v16 = vld [vmem:[%s2590_s3 + $0x18] sm:$0xff]  ;;  %v1047_v17 = vld [vmem:[%s2591_s4 + $0x8] sm:$0xff]  ;;  %v1046_v19 = vld [vmem:[%s2591_s4] sm:$0xff] }
  0x34   : > { %v590_v18 = vld [vmem:[%s2590_s3 + $0x48] sm:$0xff]  ;;  %v1050_v20 = vld [vmem:[%s2591_s4 + $0x20] sm:$0xff]  ;;  %v1048_v21 = vld [vmem:[%s2591_s4 + $0x10] sm:$0xff]  ;;  %v2380_v46 = vmul.f32 0.2631579, %v599_v45 }
  0x35   : > { %v1049_v22 = vld [vmem:[%s2591_s4 + $0x18] sm:$0xff]  ;;  %v1051_v24 = vld [vmem:[%s2591_s4 + $0x28] sm:$0xff]  ;;  %v1052_v25 = vld [vmem:[%s2591_s4 + $0x30] sm:$0xff] }
  0x36   : > { %v1053_v23 = vld [vmem:[%s2591_s4 + $0x38] sm:$0xff]  ;;  %v1056_v26 = vld [vmem:[%s2591_s4 + $0x50] sm:$0xff]  ;;  %v1054_v27 = vld [vmem:[%s2591_s4 + $0x40] sm:$0xff] }
  0x37   : > { %v1055_v28 = vld [vmem:[%s2591_s4 + $0x48] sm:$0xff]  ;;  %v1057_v30 = vld [vmem:[%s2591_s4 + $0x58] sm:$0xff]  ;;  %v1058_v31 = vld [vmem:[%s2591_s4 + $0x60] sm:$0xff] }
  0x38   : > { %668 = vperm.xlu2 %1806, %v594_v5   ;;  %v1059_v29 = vld [vmem:[%s2591_s4 + $0x68] sm:$0xff]  ;;  %v1696_v32 = vld [vmem:[%s2260_s18 + $0x38] sm:$0xff]  ;;  %v1060_v33 = vld [vmem:[%s2591_s4 + $0x70] sm:$0xff] }
  0x39   : > { %658 = vperm.xlu0 %1804, %v592_v6   ;;  %628 = vperm.xlu1 %1805, %v586_v7   ;;  %v1061_v34 = vld [vmem:[%s2591_s4 + $0x78] sm:$0xff]  ;;  %v1695_v35 = vld [vmem:[%s2260_s18 + $0x30] sm:$0xff]  ;;  %v1694_v36 = vld [vmem:[%s2260_s18 + $0x28] sm:$0xff] }
  0x3a   : > { %1705 = vmatpush.bf16.msra.mxu1 %v1696_v32  ;;  %1706 = vmatpush.bf16.msra.mxu3 %v1696_v32  ;;  %v1693_v37 = vld [vmem:[%s2260_s18 + $0x20] sm:$0xff]  ;;  %v1692_v38 = vld [vmem:[%s2260_s18 + $0x18] sm:$0xff]  ;;  %v1691_v39 = vld [vmem:[%s2260_s18 + $0x10] sm:$0xff] }
  0x3b   : > { %837 = vmatpush.bf16.msra.mxu0 %v1696_v32  ;;  %v1690_v41 = vld [vmem:[%s2260_s18 + $0x8] sm:$0xff]  ;;  %v1689_v44 = vld [vmem:[%s2260_s18] sm:$0xff] }
  0x3e   : > { %1707 = vmatpush.bf16.msra.mxu1 %v1695_v35  ;;  %1708 = vmatpush.bf16.msra.mxu3 %v1695_v35 }
  0x3f   : > { %838 = vmatpush.bf16.msra.mxu0 %v1695_v35  ;;  %v1686_v35 = vld [vmem:[%s2255_s14 + $0x28] sm:$0xff] }
  0x40   : > { %633 = vperm.xlu2 %1806, %v587_v8  }
  0x41   : > { %603 = vperm.xlu0 %1804, %v581_v9   ;;  %608 = vperm.xlu1 %1805, %v582_v10  }
  0x42   : > { %1709 = vmatpush.bf16.msra.mxu1 %v1694_v36  ;;  %1710 = vmatpush.bf16.msra.mxu3 %v1694_v36 }
  0x43   : > { %839 = vmatpush.bf16.msra.mxu0 %v1694_v36 }
  0x46   : > { %1711 = vmatpush.bf16.msra.mxu1 %v1693_v37  ;;  %1712 = vmatpush.bf16.msra.mxu3 %v1693_v37 }
  0x47   : > { %840 = vmatpush.bf16.msra.mxu0 %v1693_v37 }
  0x48   : > { %678 = vperm.xlu2 %1806, %v596_v11   ;;  %v1688_v11 = vld [vmem:[%s2255_s14 + $0x38] sm:$0xff] }
  0x49   : > { %638 = vperm.xlu0 %1804, %v588_v12   ;;  %673 = vperm.xlu1 %1805, %v595_v13  }
  0x4a   : > { %1713 = vmatpush.bf16.msra.mxu1 %v1692_v38  ;;  %1714 = vmatpush.bf16.msra.mxu3 %v1692_v38 }
  0x4b   : > { %841 = vmatpush.bf16.msra.mxu0 %v1692_v38  ;;  %563 = vmatpush.bf16.msra.mxu2 %v1688_v11 }
  0x4e   : > { %1715 = vmatpush.bf16.msra.mxu1 %v1691_v39  ;;  %1716 = vmatpush.bf16.msra.mxu3 %v1691_v39 }
  0x4f   : > { %842 = vmatpush.bf16.msra.mxu0 %v1691_v39 }
  0x50   : > { %643 = vperm.xlu2 %1806, %v589_v14  }
  0x51   : > { %613 = vperm.xlu0 %1804, %v583_v15   ;;  %618 = vperm.xlu1 %1805, %v584_v16   ;;  %v1687_v16 = vld [vmem:[%s2255_s14 + $0x30] sm:$0xff] }
  0x52   : > { %1717 = vmatpush.bf16.msra.mxu1 %v1690_v41  ;;  %1718 = vmatpush.bf16.msra.mxu3 %v1690_v41 }
  0x53   : > { %843 = vmatpush.bf16.msra.mxu0 %v1690_v41  ;;  %564 = vmatpush.bf16.msra.mxu2 %v1687_v16  ;;  %v1685_v41 = vld [vmem:[%s2255_s14 + $0x20] sm:$0xff] }
  0x56   : > { %1719 = vmatpush.bf16.msra.mxu1 %v1689_v44  ;;  %1720 = vmatpush.bf16.msra.mxu3 %v1689_v44 }
  0x57   : > { %844 = vmatpush.bf16.msra.mxu0 %v1689_v44  ;;  %565 = vmatpush.bf16.msra.mxu2 %v1686_v35 }
  0x58   : > { %1069 = vperm.xlu2 %1806, %v1047_v17  }
  0x59   : > { %648 = vperm.xlu0 %1804, %v590_v18   ;;  %1064 = vperm.xlu1 %1805, %v1046_v19  }
  0x5b   : > { %566 = vmatpush.bf16.msra.mxu2 %v1685_v41 }
  0x60   : > { %1084 = vperm.xlu2 %1806, %v1050_v20  }
  0x61   : > { %1074 = vperm.xlu0 %1804, %v1048_v21   ;;  %1079 = vperm.xlu1 %1805, %v1049_v22  }
  0x68   : > { %1099 = vperm.xlu2 %1806, %v1053_v23  }
  0x69   : > { %1089 = vperm.xlu0 %1804, %v1051_v24   ;;  %1094 = vperm.xlu1 %1805, %v1052_v25  }
  0x70   : > { %1114 = vperm.xlu2 %1806, %v1056_v26  }
  0x71   : > { %1104 = vperm.xlu0 %1804, %v1054_v27   ;;  %1109 = vperm.xlu1 %1805, %v1055_v28  }
  0x78   : > { %1129 = vperm.xlu2 %1806, %v1059_v29  }
  0x79   : > { %1119 = vperm.xlu0 %1804, %v1057_v30   ;;  %1124 = vperm.xlu1 %1805, %v1058_v31  }
  0x81   : > { %1134 = vperm.xlu0 %1804, %v1060_v33   ;;  %1139 = vperm.xlu1 %1805, %v1061_v34  }
  0x8a   : > { %v664_v43 = vpop.permute.xlu2 %663 }
  0x8b   : > { %v693_v1 = vsub.f32 %v664_v43, %v2380_v46 }
  0x8d   : > { %v709_v12 = vmul.f32 -7.2199993, %v693_v1 }
  0x8f   : > { %v725_v22 = vmul.f32 %v709_v12, %v693_v1 }
  0x91   : > { %v753_v36 = vmul.f32 1.442695, %v725_v22 }
  0x92   : > { %v669_v48 = vpop.permute.xlu2 %668 }
  0x93   : > { %v694_v4 = vsub.f32 %v669_v48, %v2380_v46 }
  0x95   : > { %v710_v14 = vmul.f32 -7.2199993, %v694_v4 }
  0x97   : > { %v726_v25 = vmul.f32 %v710_v14, %v694_v4  ;;  %v1682_v14 = vld [vmem:[%s2255_s14 + $0x8] sm:$0xff] }
  0x99   : > { %v755_v38 = vmul.f32 1.442695, %v726_v25 }
  0x9a   : > { %v634_v60 = vpop.permute.xlu2 %633 }
  0x9b   : > { %v687_v6 = vsub.f32 %v634_v60, %v2380_v46  ;;  %v1683_v60 = vld [vmem:[%s2255_s14 + $0x10] sm:$0xff] }
  0x9d   : > { %v703_v17 = vmul.f32 -7.2199993, %v687_v6 }
  0x9f   : > { %v719_v28 = vmul.f32 %v703_v17, %v687_v6 }
  0xa1   : > { %v741_v40 = vmul.f32 1.442695, %v719_v28 }
  0xa2   : > { %v679_v19 = vpop.permute.xlu2 %678 }
  0xa3   : > { %v654_v47 = vpop.permute.xlu0 %653  ;;  %v624_v50 = vpop.permute.xlu1 %623  ;;  %v696_v43 = vsub.f32 %v679_v19, %v2380_v46 }
  0xa4   : > { %v691_v49 = vsub.f32 %v654_v47, %v2380_v46  ;;  %v685_v51 = vsub.f32 %v624_v50, %v2380_v46 }
  0xa6   : > { %v707_v52 = vmul.f32 -7.2199993, %v691_v49  ;;  %v701_v53 = vmul.f32 -7.2199993, %v685_v51 }
  0xa8   : > { %v723_v54 = vmul.f32 %v707_v52, %v691_v49  ;;  %v717_v58 = vmul.f32 %v701_v53, %v685_v51 }
  0xaa   : > { %v749_v62 = vmul.f32 1.442695, %v723_v54  ;;  %v737_v2 = vmul.f32 1.442695, %v717_v58  ;;  %v644_v45 = vpop.permute.xlu2 %643 }
  0xab   : > { %v659_v55 = vpop.permute.xlu0 %658  ;;  %v629_v57 = vpop.permute.xlu1 %628  ;;  %v689_v50 = vsub.f32 %v644_v45, %v2380_v46 }
  0xac   : > { %v692_v56 = vsub.f32 %v659_v55, %v2380_v46  ;;  %v686_v59 = vsub.f32 %v629_v57, %v2380_v46  ;;  %1809 = vpow2.f32 %v749_v62  ;;  %v1684_v55 = vld [vmem:[%s2255_s14 + $0x18] sm:$0xff] }
  0xad   : > { %567 = vmatpush.bf16.msra.mxu2 %v1684_v55  ;;  %v705_v62 = vmul.f32 -7.2199993, %v689_v50 }
  0xae   : > { %v708_v61 = vmul.f32 -7.2199993, %v692_v56  ;;  %v702_v63 = vmul.f32 -7.2199993, %v686_v59 }
  0xb0   : > { %v724_v0 = vmul.f32 %v708_v61, %v692_v56  ;;  %v718_v3 = vmul.f32 %v702_v63, %v686_v59  ;;  %v712_v56 = vmul.f32 -7.2199993, %v696_v43 }
  0xb1   : > { %568 = vmatpush.bf16.msra.mxu2 %v1683_v60 }
  0xb2   : > { %v751_v5 = vmul.f32 1.442695, %v724_v0  ;;  %v739_v7 = vmul.f32 1.442695, %v718_v3  ;;  %v1810_v21 = vpop.eup %1809  ;;  %v728_v3 = vmul.f32 %v712_v56, %v696_v43 }
  0xb3   : > { %v604_v8 = vpop.permute.xlu0 %603  ;;  %v609_v9 = vpop.permute.xlu1 %608 }
  0xb4   : > { %1811 = vpow2.f32 %v751_v5  ;;  %v681_v10 = vsub.f32 %v604_v8, %v2380_v46  ;;  %v682_v13 = vsub.f32 %v609_v9, %v2380_v46  ;;  %v721_v8 = vmul.f32 %v705_v62, %v689_v50 }
  0xb5   : > { %1813 = vpow2.f32 %v737_v2  ;;  %569 = vmatpush.bf16.msra.mxu2 %v1682_v14 }
  0xb6   : > { %1815 = vpow2.f32 %v739_v7  ;;  %v697_v15 = vmul.f32 -7.2199993, %v681_v10  ;;  %v698_v18 = vmul.f32 -7.2199993, %v682_v13  ;;  %v745_v19 = vmul.f32 1.442695, %v721_v8 }
  0xb8   : > { %v713_v20 = vmul.f32 %v697_v15, %v681_v10  ;;  %v714_v23 = vmul.f32 %v698_v18, %v682_v13  ;;  %v759_v15 = vmul.f32 1.442695, %v728_v3  ;;  %v1681_v18 = vld [vmem:[%s2255_s14] sm:$0xff] }
  0xb9   : > { %570 = vmatpush.bf16.msra.mxu2 %v1681_v18 }
  0xba   : > { %v1812_v24 = vpop.eup %1811  ;;  %v729_v26 = vmul.f32 1.442695, %v713_v20  ;;  %v731_v29 = vmul.f32 1.442695, %v714_v23  ;;  %v492_v23 = vld [vmem:[#allocation2] sm:$0xff] }
  0xbb   : > { %v1814_v27 = vpop.eup %1813  ;;  %v639_v30 = vpop.permute.xlu0 %638  ;;  %v766_v31 = vpack.c.bf16 %v1812_v24, %v1810_v21  ;;  %v493_v24 = vld [vmem:[#allocation2 + $0x8] sm:$0xff] }
  0xbc   : > { %v1816_v32 = vpop.eup %1815  ;;  %1817 = vpow2.f32 %v729_v26  ;;  %v674_v33 = vpop.permute.xlu1 %673  ;;  %v688_v34 = vsub.f32 %v639_v30, %v2380_v46  ;;  %v494_v25 = vpack.c.bf16 %v493_v24, %v492_v23 }
  0xbd   : > { %1819 = vpow2.f32 %v731_v29  ;;  %v763_v37 = vpack.c.bf16 %v1816_v32, %v1814_v27  ;;  %870 = vmatmul.bf16.vlgmr.msra.gmra.mxu3 %v766_v31  ;;  %v695_v47 = vsub.f32 %v674_v33, %v2380_v46  ;;  %v2411_v33 = vld [vmem:[%s464_s2] ss:$0 sm:$0xff] }
  0xbe   : > { %v704_v39 = vmul.f32 -7.2199993, %v688_v34  ;;  %1821 = vpow2.f32 %v753_v36  ;;  %571 = vmatmul.bf16.vlgmr.msra.gmra.mxu2 %v494_v25 }
  0xbf   : > { %855 = vmatmul.bf16.vlgmr.msra.gmra.mxu1 %v763_v37  ;;  %1823 = vpow2.f32 %v755_v38  ;;  %v711_v58 = vmul.f32 -7.2199993, %v695_v47  ;;  %v2417_v37 = vpop.permute.xlu2 %1069 }
  0xc0   : > { %v720_v42 = vmul.f32 %v704_v39, %v688_v34  ;;  %1825 = vpow2.f32 %v741_v40 }
  0xc1   : > { %v727_v6 = vmul.f32 %v711_v58, %v695_v47 }
  0xc2   : > { %v1818_v44 = vpop.eup %1817  ;;  %v743_v48 = vmul.f32 1.442695, %v720_v42 }
  0xc3   : > { %v1820_v49 = vpop.eup %1819  ;;  %v614_v51 = vpop.permute.xlu0 %613  ;;  %v757_v16 = vmul.f32 1.442695, %v727_v6 }
  0xc4   : > { %1827 = vpow2.f32 %v743_v48  ;;  %v619_v52 = vpop.permute.xlu1 %618  ;;  %v683_v53 = vsub.f32 %v614_v51, %v2380_v46  ;;  %v761_v54 = vpack.c.bf16 %v1820_v49, %v1818_v44  ;;  %v1822_v61 = vpop.eup %1821 }
  0xc5   : > { %v684_v57 = vsub.f32 %v619_v52, %v2380_v46  ;;  %v1824_v0 = vpop.eup %1823 }
  0xc6   : > { %v699_v59 = vmul.f32 -7.2199993, %v683_v53  ;;  %845 = vmatmul.bf16.vlgmr.msra.gmra.mxu0 %v761_v54  ;;  %v1826_v2 = vpop.eup %1825  ;;  %v767_v12 = vpack.c.bf16 %v1824_v0, %v1822_v61 }
  0xc7   : > { %v700_v63 = vmul.f32 -7.2199993, %v684_v57  ;;  %v2438_v58 = vpop.permute.xlu2 %1084 }
  0xc8   : > { %v715_v1 = vmul.f32 %v699_v59, %v683_v53 }
  0xc9   : > { %v716_v4 = vmul.f32 %v700_v63, %v684_v57 }
  0xca   : > { %v1828_v5 = vpop.eup %1827  ;;  %v733_v7 = vmul.f32 1.442695, %v715_v1 }
  0xcb   : > { %v735_v9 = vmul.f32 1.442695, %v716_v4  ;;  %v649_v10 = vpop.permute.xlu0 %648  ;;  %v764_v11 = vpack.c.bf16 %v1828_v5, %v1826_v2 }
  0xcc   : > { %1829 = vpow2.f32 %v733_v7  ;;  %v690_v13 = vsub.f32 %v649_v10, %v2380_v46  ;;  %v2429_v49 = vpop.permute.xlu1 %1064 }
  0xcd   : > { %1831 = vpow2.f32 %v735_v9  ;;  %875 = vmatmul.bf16.gmra.mxu3 %v767_v12 }
  0xce   : > { %v706_v17 = vmul.f32 -7.2199993, %v690_v13  ;;  %1833 = vpow2.f32 %v759_v15 }
  0xcf   : > { %860 = vmatmul.bf16.gmra.mxu1 %v764_v11  ;;  %1835 = vpow2.f32 %v757_v16  ;;  %v2457_v24 = vpop.permute.xlu2 %1099 }
  0xd0   : > { %v722_v20 = vmul.f32 %v706_v17, %v690_v13  ;;  %1837 = vpow2.f32 %v745_v19 }
  0xd2   : > { %v1830_v21 = vpop.eup %1829  ;;  %v747_v22 = vmul.f32 1.442695, %v722_v20 }
  0xd3   : > { %v1832_v46 = vpop.eup %1831  ;;  %v2433_v53 = vpop.permute.xlu0 %1074 }
  0xd4   : > { %1839 = vpow2.f32 %v747_v22  ;;  %v762_v26 = vpack.c.bf16 %v1832_v46, %v1830_v21  ;;  %v1834_v27 = vpop.eup %1833  ;;  %v2449_v9 = vpop.permute.xlu1 %1079 }
  0xd5   : > { %v1836_v28 = vpop.eup %1835 }
  0xd6   : > { %850 = vmatmul.bf16.gmra.mxu0 %v762_v26  ;;  %v1838_v29 = vpop.eup %1837  ;;  %v768_v32 = vpack.c.bf16 %v1834_v27, %v1836_v28 }
  0xda   : > { %v1840_v30 = vpop.eup %1839 }
  0xdb   : > { %v765_v31 = vpack.c.bf16 %v1840_v30, %v1838_v29  ;;  %v2454_v16 = vpop.permute.xlu0 %1089 }
  0xdd   : > { %880 = vmatmul.bf16.gmra.mxu3 %v768_v32 }
  0xdf   : > { %865 = vmatmul.bf16.gmra.mxu1 %v765_v31 }
 0x13c   : > { %v856_v34 = vpop.f32.mrf.mxu1 }
 0x13d   : > { %v2414_v35 = vadd.f32 %v2411_v33, %v856_v34 }
 0x13f   : > { %v906_v36 = vand.u32 2147483647, %v2414_v35  ;;  %v890_v46 = vmax.f32 %v2414_v35, 0.0 }
 0x140   : > { %v871_v38 = vpop.f32.mrf.mxu3 }
 0x141   : > { %v922_v39 = vsub.f32 0.0, %v906_v36  ;;  %v2420_v40 = vadd.f32 %v2411_v33, %v871_v38 }
 0x143   : > { %v942_v41 = vmul.f32 1.442695, %v922_v39  ;;  %v912_v42 = vand.u32 2147483647, %v2420_v40  ;;  %v846_v43 = vpop.f32.mrf.mxu0  ;;  %v896_v38 = vmax.f32 %v2420_v40, 0.0 }
 0x144   : > { %v2424_v44 = vadd.f32 %v2411_v33, %v846_v43  ;;  %v858_v45 = vpop.f32.mrf.mxu1 }
 0x145   : > { %1841 = vpow2.f32 %v942_v41  ;;  %v928_v47 = vsub.f32 0.0, %v912_v42  ;;  %v2427_v48 = vadd.f32 %v2411_v33, %v858_v45 }
 0x146   : > { %v902_v50 = vand.u32 2147483647, %v2424_v44 }
 0x147   : > { %v954_v51 = vmul.f32 1.442695, %v928_v47  ;;  %v907_v52 = vand.u32 2147483647, %v2427_v48 }
 0x148   : > { %v918_v54 = vsub.f32 0.0, %v902_v50  ;;  %v873_v55 = vpop.f32.mrf.mxu3 }
 0x149   : > { %1843 = vpow2.f32 %v954_v51  ;;  %v923_v56 = vsub.f32 0.0, %v907_v52  ;;  %v2436_v57 = vadd.f32 %v2411_v33, %v873_v55  ;;  %v2472_v52 = vpop.permute.xlu1 %1094 }
 0x14a   : > { %v934_v59 = vmul.f32 1.442695, %v918_v54  ;;  %v886_v54 = vmax.f32 %v2424_v44, 0.0 }
 0x14b   : > { %v1842_v60 = vpop.eup %1841  ;;  %v944_v61 = vmul.f32 1.442695, %v923_v56  ;;  %v913_v62 = vand.u32 2147483647, %v2436_v57  ;;  %v848_v63 = vpop.f32.mrf.mxu0 }
 0x14c   : > { %v970_v0 = vadd.f32 1.0, %v1842_v60  ;;  %1845 = vpow2.f32 %v934_v59  ;;  %v2442_v1 = vadd.f32 %v2411_v33, %v848_v63  ;;  %v861_v2 = vpop.f32.mrf.mxu1 }
 0x14d   : > { %1847 = vpow2.f32 %v944_v61  ;;  %v929_v3 = vsub.f32 0.0, %v913_v62  ;;  %v2445_v4 = vadd.f32 %v2411_v33, %v861_v2  ;;  %v891_v61 = vmax.f32 %v2427_v48, 0.0  ;;  %v2477_v2 = vpop.permute.xlu0 %1104  ;;  %v1115_v48 = vpop.permute.xlu2 %1114 }
 0x14e   : > { %1849 = vlog2.f32 %v970_v0  ;;  %v903_v5 = vand.u32 2147483647, %v2442_v1 }
 0x14f   : > { %v1844_v6 = vpop.eup %1843  ;;  %v956_v7 = vmul.f32 1.442695, %v929_v3  ;;  %v908_v8 = vand.u32 2147483647, %v2445_v4 }
 0x150   : > { %v976_v10 = vadd.f32 1.0, %v1844_v6  ;;  %v919_v11 = vsub.f32 0.0, %v903_v5  ;;  %v876_v12 = vpop.f32.mrf.mxu3 }
 0x151   : > { %1851 = vpow2.f32 %v956_v7  ;;  %v924_v13 = vsub.f32 0.0, %v908_v8  ;;  %v2452_v14 = vadd.f32 %v2411_v33, %v876_v12 }
 0x152   : > { %v1846_v15 = vpop.eup %1845  ;;  %1853 = vlog2.f32 %v976_v10  ;;  %v936_v17 = vmul.f32 1.442695, %v919_v11 }
 0x153   : > { %v1848_v18 = vpop.eup %1847  ;;  %v966_v19 = vadd.f32 1.0, %v1846_v15  ;;  %v946_v20 = vmul.f32 1.442695, %v924_v13  ;;  %v914_v21 = vand.u32 2147483647, %v2452_v14  ;;  %v851_v22 = vpop.f32.mrf.mxu0 }
 0x154   : > { %v1850_v23 = vpop.eup %1849  ;;  %v971_v25 = vadd.f32 1.0, %v1848_v18  ;;  %1855 = vpow2.f32 %v936_v17  ;;  %v2461_v26 = vadd.f32 %v2411_v33, %v851_v22  ;;  %v863_v27 = vpop.f32.mrf.mxu1 }
 0x155   : > { %v991_v28 = vmul.f32 0.6931472, %v1850_v23  ;;  %1857 = vlog2.f32 %v966_v19  ;;  %v930_v29 = vsub.f32 0.0, %v914_v21  ;;  %v2464_v30 = vadd.f32 %v2411_v33, %v863_v27 }
 0x156   : > { %1859 = vlog2.f32 %v971_v25  ;;  %v904_v31 = vand.u32 2147483647, %v2461_v26  ;;  %v897_v19 = vmax.f32 %v2436_v57, 0.0  ;;  %v887_v57 = vmax.f32 %v2442_v1, 0.0 }
 0x157   : > { %v1852_v32 = vpop.eup %1851  ;;  %v1018_v34 = vadd.f32 %v991_v28, %v890_v46  ;;  %1861 = vpow2.f32 %v946_v20  ;;  %v958_v36 = vmul.f32 1.442695, %v930_v29  ;;  %v909_v42 = vand.u32 2147483647, %v2464_v30 }
 0x158   : > { %v1854_v35 = vpop.eup %1853  ;;  %v977_v39 = vadd.f32 1.0, %v1852_v32  ;;  %v920_v41 = vsub.f32 0.0, %v904_v31  ;;  %v878_v43 = vpop.f32.mrf.mxu3 }
 0x159   : > { %v1619_v45 = vadd.f32 -0.6931472, %v1018_v34  ;;  %v1003_v47 = vmul.f32 0.6931472, %v1854_v35  ;;  %1863 = vpow2.f32 %v958_v36  ;;  %v2470_v50 = vadd.f32 %v2411_v33, %v878_v43  ;;  %v572_v35 = vpop.f32.mrf.mxu2 }
 0x15a   : > { %v1856_v51 = vpop.eup %1855  ;;  %1865 = vlog2.f32 %v977_v39  ;;  %v938_v55 = vmul.f32 1.442695, %v920_v41  ;;  %v925_v56 = vsub.f32 0.0, %v909_v42 }
 0x15b   : > { %v1858_v40 = vpop.eup %1857  ;;  %v1146_v59 = vmul.f32 %v1619_v45, %v2438_v58  ;;  %v1024_v60 = vadd.f32 %v1003_v47, %v896_v38  ;;  %v967_v62 = vadd.f32 1.0, %v1856_v51  ;;  %v853_v63 = vpop.f32.mrf.mxu0  ;;  %v915_v6 = vand.u32 2147483647, %v2470_v50 }
 0x15c   : > { %v1860_v0 = vpop.eup %1859  ;;  %v983_v3 = vmul.f32 0.6931472, %v1858_v40  ;;  %1867 = vpow2.f32 %v938_v55  ;;  %v948_v5 = vmul.f32 1.442695, %v925_v56  ;;  %v866_v44 = vpop.f32.mrf.mxu1  ;;  %v2481_v58 = vadd.f32 %v2411_v33, %v853_v63 }
 0x15d   : > { %v1862_v7 = vpop.eup %1861  ;;  %1162 = vst [vmem:[#allocation4 + $0x20] sm:$0xff] %v1146_v59  ;;  %v1625_v8 = vadd.f32 -0.6931472, %v1024_v60  ;;  %v993_v10 = vmul.f32 0.6931472, %v1860_v0  ;;  %1869 = vlog2.f32 %v967_v62  ;;  %v931_v13 = vsub.f32 0.0, %v915_v6  ;;  %v2494_v45 = vpop.permute.xlu1 %1109 }
 0x15e   : > { %v1014_v11 = vadd.f32 %v983_v3, %v886_v54  ;;  %v972_v12 = vadd.f32 1.0, %v1862_v7  ;;  %1871 = vpow2.f32 %v948_v5  ;;  %v905_v20 = vand.u32 2147483647, %v2481_v58  ;;  %v1120_v40 = vpop.permute.xlu0 %1119 }
 0x15f   : > { %v1864_v15 = vpop.eup %1863  ;;  %v1152_v17 = vmul.f32 %v1625_v8, %v1115_v48  ;;  %v1019_v18 = vadd.f32 %v993_v10, %v891_v61  ;;  %v960_v46 = vmul.f32 1.442695, %v931_v13  ;;  %v2486_v31 = vadd.f32 %v2411_v33, %v866_v44 }
 0x160   : > { %v1866_v21 = vpop.eup %1865  ;;  %v1615_v22 = vadd.f32 -0.6931472, %v1014_v11  ;;  %1873 = vlog2.f32 %v972_v12  ;;  %v978_v23 = vadd.f32 1.0, %v1864_v15  ;;  %v881_v25 = vpop.f32.mrf.mxu3  ;;  %v921_v29 = vsub.f32 0.0, %v905_v20 }
 0x161   : > { %1168 = vst [vmem:[#allocation4 + $0x50] sm:$0xff] %v1152_v17  ;;  %v1620_v27 = vadd.f32 -0.6931472, %v1019_v18  ;;  %v1005_v28 = vmul.f32 0.6931472, %v1866_v21  ;;  %v2491_v36 = vadd.f32 %v2411_v33, %v881_v25  ;;  %v898_v60 = vmax.f32 %v2452_v14, 0.0 }
 0x162   : > { %v1868_v32 = vpop.eup %1867  ;;  %v1142_v34 = vmul.f32 %v1615_v22, %v2429_v49  ;;  %1875 = vlog2.f32 %v978_v23  ;;  %v892_v49 = vmax.f32 %v2445_v4, 0.0  ;;  %v940_v1 = vmul.f32 1.442695, %v921_v29  ;;  %v1808_v4 = vld [vmem:[%s456_s23] ss:$0 sm:$0xff]  ;;  %s2528_s23 = smov 0  }
 0x163   : > { %v1870_v38 = vpop.eup %1869  ;;  %v1147_v39 = vmul.f32 %v1620_v27, %v2454_v16  ;;  %v1025_v41 = vadd.f32 %v1005_v28, %v897_v19  ;;  %v968_v42 = vadd.f32 1.0, %v1868_v32  ;;  %1877 = vpow2.f32 %v960_v46 }
 0x164   : > { %v1872_v43 = vpop.eup %1871  ;;  %1158 = vst [vmem:[#allocation4] sm:$0xff] %v1142_v34  ;;  %v985_v47 = vmul.f32 0.6931472, %v1870_v38  ;;  %v910_v55 = vand.u32 2147483647, %v2486_v31  ;;  %v868_v56 = vpop.f32.mrf.mxu1  ;;  %v573_v14 = vadd.f32 %v1808_v4, %v572_v35  ;;  %v888_v15 = vmax.f32 %v2461_v26, 0.0 }
 0x165   : > { %1163 = vst [vmem:[#allocation4 + $0x28] sm:$0xff] %v1147_v39  ;;  %v1626_v51 = vadd.f32 -0.6931472, %v1025_v41  ;;  %1879 = vlog2.f32 %v968_v42  ;;  %v973_v54 = vadd.f32 1.0, %v1872_v43  ;;  %v916_v61 = vand.u32 2147483647, %v2491_v36  ;;  %v1125_v32 = vpop.permute.xlu1 %1124 }
 0x166   : > { %v1874_v16 = vpop.eup %1873  ;;  %v1015_v59 = vadd.f32 %v985_v47, %v887_v57  ;;  %1881 = vpow2.f32 %v940_v1  ;;  %v926_v0 = vsub.f32 0.0, %v910_v55  ;;  %v2506_v44 = vadd.f32 %v2411_v33, %v868_v56  ;;  %577 = vst [vmem:[#allocation3] sm:$0xff] %v573_v14 }
 0x167   : > { %v1153_v62 = vmul.f32 %v1626_v51, %v1120_v40  ;;  %v995_v63 = vmul.f32 0.6931472, %v1874_v16  ;;  %1883 = vlog2.f32 %v973_v54  ;;  %v932_v6 = vsub.f32 0.0, %v916_v61 }
 0x168   : > { %v1876_v3 = vpop.eup %1875  ;;  %v1616_v5 = vadd.f32 -0.6931472, %v1015_v59  ;;  %v883_v7 = vpop.f32.mrf.mxu3  ;;  %v950_v11 = vmul.f32 1.442695, %v926_v0  ;;  %v911_v22 = vand.u32 2147483647, %v2506_v44 }
 0x169   : > { %v1878_v8 = vpop.eup %1877  ;;  %1169 = vst [vmem:[#allocation4 + $0x58] sm:$0xff] %v1153_v62  ;;  %v1020_v10 = vadd.f32 %v995_v63, %v892_v49  ;;  %v1007_v48 = vmul.f32 0.6931472, %v1876_v3  ;;  %v2509_v12 = vadd.f32 %v2411_v33, %v883_v7  ;;  %v962_v18 = vmul.f32 1.442695, %v932_v6  ;;  %v1130_v0 = vpop.permute.xlu2 %1129 }
 0x16a   : > { %v1143_v13 = vmul.f32 %v1616_v5, %v2417_v37  ;;  %v979_v17 = vadd.f32 1.0, %v1878_v8  ;;  %1885 = vpow2.f32 %v950_v11  ;;  %v893_v25 = vmax.f32 %v2464_v30, 0.0  ;;  %v574_v37 = vpop.f32.mrf.mxu2 }
 0x16b   : > { %v1880_v19 = vpop.eup %1879  ;;  %v1621_v20 = vadd.f32 -0.6931472, %v1020_v10  ;;  %v1026_v21 = vadd.f32 %v1007_v48, %v898_v60  ;;  %v917_v33 = vand.u32 2147483647, %v2509_v12  ;;  %v927_v35 = vsub.f32 0.0, %v911_v22 }
 0x16c   : > { %v1882_v23 = vpop.eup %1881  ;;  %1159 = vst [vmem:[#allocation4 + $0x8] sm:$0xff] %v1143_v13  ;;  %v987_v46 = vmul.f32 0.6931472, %v1880_v19  ;;  %1887 = vlog2.f32 %v979_v17  ;;  %v575_v41 = vadd.f32 %v1808_v4, %v574_v37  ;;  %v899_v56 = vmax.f32 %v2470_v50, 0.0 }
 0x16d   : > { %v1884_v27 = vpop.eup %1883  ;;  %v1148_v26 = vmul.f32 %v1621_v20, %v2472_v52  ;;  %v1627_v28 = vadd.f32 -0.6931472, %v1026_v21  ;;  %v969_v29 = vadd.f32 1.0, %v1882_v23  ;;  %1889 = vpow2.f32 %v962_v18  ;;  %v1135_v23 = vpop.permute.xlu0 %1134 }
 0x16e   : > { %v1016_v34 = vadd.f32 %v987_v46, %v888_v15  ;;  %v997_v57 = vmul.f32 0.6931472, %v1884_v27  ;;  %v933_v38 = vsub.f32 0.0, %v917_v33  ;;  %v952_v43 = vmul.f32 1.442695, %v927_v35  ;;  %578 = vst [vmem:[#allocation3 + $0x8] sm:$0xff] %v575_v41 }
 0x16f   : > { %1164 = vst [vmem:[#allocation4 + $0x30] sm:$0xff] %v1148_v26  ;;  %v1154_v39 = vmul.f32 %v1627_v28, %v1125_v32  ;;  %1891 = vlog2.f32 %v969_v29  ;;  %v889_v4 = vmax.f32 %v2481_v58, 0.0  ;;  %v900_v13 = vmax.f32 %v2491_v36, 0.0  ;;  %v1140_v28 = vpop.permute.xlu1 %1139 }
 0x170   : > { %v1617_v30 = vadd.f32 -0.6931472, %v1016_v34  ;;  %v1021_v42 = vadd.f32 %v997_v57, %v893_v25  ;;  %v964_v47 = vmul.f32 1.442695, %v933_v38  ;;  %v1886_v49 = vpop.eup %1885  ;;  %1893 = vpow2.f32 %v952_v43 }
 0x171   : > { %1170 = vst [vmem:[#allocation4 + $0x60] sm:$0xff] %v1154_v39  ;;  %v974_v54 = vadd.f32 1.0, %v1886_v49 }
 0x172   : > { %v1888_v1 = vpop.eup %1887  ;;  %v1144_v52 = vmul.f32 %v1617_v30, %v2433_v53  ;;  %v1622_v51 = vadd.f32 -0.6931472, %v1021_v42  ;;  %1895 = vpow2.f32 %v964_v47 }
 0x173   : > { %v1890_v55 = vpop.eup %1889  ;;  %v1009_v16 = vmul.f32 0.6931472, %v1888_v1  ;;  %1897 = vlog2.f32 %v974_v54 }
 0x174   : > { %1160 = vst [vmem:[#allocation4 + $0x10] sm:$0xff] %v1144_v52  ;;  %v1149_v40 = vmul.f32 %v1622_v51, %v2457_v24  ;;  %v980_v59 = vadd.f32 1.0, %v1890_v55  ;;  %v894_v24 = vmax.f32 %v2486_v31, 0.0  ;;  %v895_v31 = vmax.f32 %v2506_v44, 0.0 }
 0x175   : > { %v1892_v60 = vpop.eup %1891  ;;  %v1027_v61 = vadd.f32 %v1009_v16, %v899_v56 }
 0x176   : > { %1165 = vst [vmem:[#allocation4 + $0x38] sm:$0xff] %v1149_v40  ;;  %v989_v53 = vmul.f32 0.6931472, %v1892_v60  ;;  %1899 = vlog2.f32 %v980_v59  ;;  %v1894_v63 = vpop.eup %1893 }
 0x177   : > { %v1628_v62 = vadd.f32 -0.6931472, %v1027_v61  ;;  %v975_v6 = vadd.f32 1.0, %v1894_v63 }
 0x178   : > { %v1017_v3 = vadd.f32 %v989_v53, %v889_v4  ;;  %v1896_v5 = vpop.eup %1895 }
 0x179   : > { %v1155_v50 = vmul.f32 %v1628_v62, %v1130_v0  ;;  %v1898_v7 = vpop.eup %1897  ;;  %v981_v8 = vadd.f32 1.0, %v1896_v5  ;;  %1901 = vlog2.f32 %v975_v6 }
 0x17a   : > { %v1618_v14 = vadd.f32 -0.6931472, %v1017_v3  ;;  %v999_v10 = vmul.f32 0.6931472, %v1898_v7 }
 0x17b   : > { %1171 = vst [vmem:[#allocation4 + $0x68] sm:$0xff] %v1155_v50  ;;  %1903 = vlog2.f32 %v981_v8 }
 0x17c   : > { %v1900_v48 = vpop.eup %1899  ;;  %v1145_v58 = vmul.f32 %v1618_v14, %v2449_v9  ;;  %v1022_v11 = vadd.f32 %v999_v10, %v894_v24  ;;  %v901_v9 = vmax.f32 %v2509_v12, 0.0 }
 0x17d   : > { %v1011_v15 = vmul.f32 0.6931472, %v1900_v48 }
 0x17e   : > { %1161 = vst [vmem:[#allocation4 + $0x18] sm:$0xff] %v1145_v58  ;;  %v1623_v17 = vadd.f32 -0.6931472, %v1022_v11 }
 0x17f   : > { %v1028_v18 = vadd.f32 %v1011_v15, %v900_v13  ;;  %v1902_v19 = vpop.eup %1901 }
 0x180   : > { %v1150_v20 = vmul.f32 %v1623_v17, %v2477_v2  ;;  %v1001_v46 = vmul.f32 0.6931472, %v1902_v19 }
 0x181   : > { %v1629_v21 = vadd.f32 -0.6931472, %v1028_v18  ;;  %v1904_v22 = vpop.eup %1903 }
 0x182   : > { %1166 = vst [vmem:[#allocation4 + $0x40] sm:$0xff] %v1150_v20  ;;  %v1013_v33 = vmul.f32 0.6931472, %v1904_v22  ;;  %v1023_v37 = vadd.f32 %v1001_v46, %v895_v31 }
 0x183   : > { %v1156_v25 = vmul.f32 %v1629_v21, %v1135_v23 }
 0x184   : > { %v1029_v36 = vadd.f32 %v1013_v33, %v901_v9  ;;  %v1624_v27 = vadd.f32 -0.6931472, %v1023_v37 }
 0x185   : > { %1172 = vst [vmem:[#allocation4 + $0x70] sm:$0xff] %v1156_v25 }
 0x186   : > { %v1630_v26 = vadd.f32 -0.6931472, %v1029_v36  ;;  %v1151_v29 = vmul.f32 %v1624_v27, %v2494_v45 }
 0x188   : > { %v1157_v2 = vmul.f32 %v1630_v26, %v1140_v28  ;;  %1167 = vst [vmem:[#allocation4 + $0x48] sm:$0xff] %v1151_v29 }
 0x18a   : > { %1173 = vst [vmem:[#allocation4 + $0x78] sm:$0xff] %v1157_v2 }
 0x18b LB: >> { %s2534_s25 = sshll.u32 %s2092_s23, 2  ;;  %s1180_s23 = sadd.s32 1, %s2092_s23   ;;  %s2092_s23 = sphi %s2528_s23, %s1180_s23  }
 0x18c   : >> { %s1183_s12 = sld [smem:[#allocation9 + %s2534_s25]]  ;;  %s1194_s29 = sadd.s32 1, %s2534_s25 }
 0x18d   : >> { %s1184_s20 = sld [smem:[#allocation8 + %s2534_s25]]  ;;  %s2540_s15 = scalar_lea.vmem [#allocation4], %s2534_s25 }
 0x18e   : >> { %s1196_s13 = sld [smem:[#allocation9 + %s1194_s29]]  ;;  %s1207_s1 = sadd.s32 2, %s2534_s25 }
 0x18f   : >> { %s1197_s9 = sld [smem:[#allocation8 + %s1194_s29]]  ;;  %s1220_s2 = sadd.s32 3, %s2534_s25 }
 0x190   : >> { %s1209_s24 = sld [smem:[#allocation9 + %s1207_s1]]  ;;  %p1177_p1 = scmp.ge.s32.totalorder %s1180_s23, 32  }
 0x191   : >> { %v1188_v45 = vld [vmem:[%s2540_s15] sm:$0x1]  ;;  %v1633_v35 = vld [vmem:[%s2540_s15 + $0x1] sm:$0x1]  ;;  %s1210_s18 = sld [smem:[#allocation8 + %s1207_s1]]  ;;  %v1704_v56 = vld [vmem:[%s2233_s21 + $0x38] sm:$0xff] (%p1177_p1) }
 0x192   : >> { %s1185_s22 = scalar_lea.vmem [#allocation3], %s1183_s12  ;;  %s1222_s12 = sld [smem:[#allocation9 + %s1220_s2]]  ;;  %v1635_v30 = vld [vmem:[%s2540_s15 + $0x2] sm:$0x1]  ;;  %v1637_v52 = vld [vmem:[%s2540_s15 + $0x3] sm:$0x1]  ;;  %1307 = vmatpush.bf16.msrb.mxu2 (%p1177_p1), %v1704_v56 }
 0x193   : >> { %v1186_v44 = vld [vmem:[%s1185_s22] sm:$0x1]  ;;  %s1190_s30 = scalar_lea.vmem [#allocation5], %s1184_s20  ;;  %s1223_s29 = sld [smem:[#allocation8 + %s1220_s2]]  ;;  %v1702_v40 = vld [vmem:[%s2233_s21 + $0x28] sm:$0xff] (%p1177_p1)  ;;  %v1701_v59 = vld [vmem:[%s2233_s21 + $0x20] sm:$0xff] (%p1177_p1) }
 0x194   : >> { %v1189_v12 = vmul.f32 %v1188_v45, %v1186_v44  ;;  %v1191_v32 = vld [vmem:[%s1190_s30] sm:$0x1]  ;;  %s1198_s14 = scalar_lea.vmem [#allocation3], %s1196_s13  ;;  %v1700_v60 = vld [vmem:[%s2233_s21 + $0x18] sm:$0xff] (%p1177_p1)  ;;  %v1698_v4 = vld [vmem:[%s2233_s21 + $0x8] sm:$0xff] (%p1177_p1)  ;;  %p1672_p2 = scmp.ne.s32.totalorder (%p1177_p1), %s2080_s27, 1 }
 0x195   : >> { %v1199_v57 = vld [vmem:[%s1198_s14] sm:$0x1]  ;;  %s1203_s17 = scalar_lea.vmem [#allocation5], %s1197_s9  ;;  %v1697_v53 = vld [vmem:[%s2233_s21] sm:$0xff] (%p1177_p1)  ;;  %v1322_v37 = vld [vmem:[#allocation2 + $0x8] sm:$0xff] (%p1177_p1) }
 0x196   : >> { %v1192_v34 = vadd.f32 %v1191_v32, %v1189_v12  ;;  %v1202_v38 = vmul.f32 %v1633_v35, %v1199_v57  ;;  %s1211_s20 = scalar_lea.vmem [#allocation3], %s1209_s24  ;;  %v1703_v16 = vld [vmem:[%s2233_s21 + $0x30] sm:$0xff] (%p1177_p1) }
 0x197   : >> { %v1212_v42 = vld [vmem:[%s1211_s20] sm:$0x1]  ;;  %s1216_s22 = scalar_lea.vmem [#allocation5], %s1210_s18  ;;  %1308 = vmatpush.bf16.msrb.mxu2 (%p1177_p1), %v1703_v16 }
 0x198   : >> { %1193 = vst [vmem:[%s1190_s30] sm:$0x1] %v1192_v34  ;;  %v1215_v43 = vmul.f32 %v1635_v30, %v1212_v42  ;;  %s1224_s13 = scalar_lea.vmem [#allocation3], %s1222_s12  ;;  %v1699_v61 = vld [vmem:[%s2233_s21 + $0x10] sm:$0xff] (%p1177_p1) }
 0x199   : >> { %v1225_v1 = vld [vmem:[%s1224_s13] sm:$0x1]  ;;  %s1229_s25 = scalar_lea.vmem [#allocation5], %s1223_s29 }
 0x19a   : >> { %v1228_v51 = vmul.f32 %v1637_v52, %v1225_v1  ;;  %v1905_v3 = vld [vmem:[%s467_s16] ss:$0 sm:$0xff] (%p1177_p1) }
 0x19b   : > { %1309 = vmatpush.bf16.msrb.mxu2 (%p1177_p1), %v1702_v40  ;;  %v1321_v22 = vld [vmem:[#allocation2] sm:$0xff] (%p1177_p1) }
 0x19f   : >> { %v1204_v39 = vld [vmem:[%s1203_s17] sm:$0x1]  ;;  %1310 = vmatpush.bf16.msrb.mxu2 (%p1177_p1), %v1701_v59 }
 0x1a0   : >> { %v1205_v41 = vadd.f32 %v1204_v39, %v1202_v38 }
 0x1a2   : >> { %1206 = vst [vmem:[%s1203_s17] sm:$0x1] %v1205_v41 }
 0x1a3   : > { %1311 = vmatpush.bf16.msrb.mxu2 (%p1177_p1), %v1700_v60 }
 0x1a7   : > { %1312 = vmatpush.bf16.msrb.mxu2 (%p1177_p1), %v1699_v61 }
 0x1a9   : >> { %v1217_v47 = vld [vmem:[%s1216_s22] sm:$0x1] }
 0x1aa   : >> { %v1218_v49 = vadd.f32 %v1217_v47, %v1215_v43 }
 0x1ab   : > { %1313 = vmatpush.bf16.msrb.mxu2 (%p1177_p1), %v1698_v4 }
 0x1ac   : >> { %1219 = vst [vmem:[%s1216_s22] sm:$0x1] %v1218_v49 }
 0x1af   : > { %1314 = vmatpush.bf16.msrb.mxu2 (%p1177_p1), %v1697_v53 }
 0x1b2   : > { %1179 = sbr.rel (!%p1177_p1) target bundleno = 395 (0x18b), region = 149 }
 0x1b3   : >> { %v1230_v54 = vld [vmem:[%s1229_s25] sm:$0x1] }
 0x1b4   : >> { %v1231_v55 = vadd.f32 %v1230_v54, %v1228_v51 }
 0x1b6   : >> { %1232 = vst [vmem:[%s1229_s25] sm:$0x1] %v1231_v55 }
 0x1bd   : > { %v1236_v62 = vld [vmem:[#allocation5] sm:$0xff]  ;;  %v1237_v63 = vld [vmem:[#allocation5 + $0x8] sm:$0xff] }
 0x1be   : > { %v1238_v0 = vpack.c.bf16 %v1237_v63, %v1236_v62 }
 0x1c0   : > { %1315 = vmatmul.bf16.vlgmr.msrb.gmra.mxu2 %v1238_v0 }
 0x243   : > { %v1316_v5 = vpop.f32.mrf.mxu2 }
 0x244   : > { %v1317_v50 = vadd.f32 %v1905_v3, %v1316_v5 }
 0x246   : > { %v1325_v6 = vand.u32 2147483647, %v1317_v50  ;;  %v1323_v19 = vmax.f32 %v1317_v50, 0.0 }
 0x248   : > { %v1327_v7 = vsub.f32 0.0, %v1325_v6 }
 0x24a   : > { %v1329_v14 = vmul.f32 1.442695, %v1327_v7 }
 0x24b   : > { %v1318_v8 = vpop.f32.mrf.mxu2 }
 0x24c   : > { %1906 = vpow2.f32 %v1329_v14  ;;  %v1319_v24 = vadd.f32 %v1905_v3, %v1318_v8 }
 0x24e   : > { %v1326_v10 = vand.u32 2147483647, %v1319_v24  ;;  %v1324_v25 = vmax.f32 %v1319_v24, 0.0 }
 0x250   : > { %v1328_v48 = vsub.f32 0.0, %v1326_v10 }
 0x252   : > { %v1907_v58 = vpop.eup %1906  ;;  %v1331_v11 = vmul.f32 1.442695, %v1328_v48 }
 0x253   : > { %v1333_v13 = vadd.f32 1.0, %v1907_v58 }
 0x254   : > { %1908 = vpow2.f32 %v1331_v11 }
 0x255   : > { %1910 = vlog2.f32 %v1333_v13 }
 0x25a   : > { %v1909_v15 = vpop.eup %1908 }
 0x25b   : > { %v1911_v17 = vpop.eup %1910  ;;  %v1334_v18 = vadd.f32 1.0, %v1909_v15 }
 0x25c   : > { %v1336_v20 = vmul.f32 0.6931472, %v1911_v17 }
 0x25d   : > { %1912 = vlog2.f32 %v1334_v18 }
 0x25e   : > { %v1339_v21 = vadd.f32 %v1336_v20, %v1323_v19 }
 0x260   : > { %v1670_v23 = vadd.f32 -0.6931472, %v1339_v21 }
 0x262   : > { %v1343_v31 = vadd.f32 %v1670_v23, %v1321_v22 }
 0x263   : > { %v1913_v46 = vpop.eup %1912 }
 0x264   : > { %1345 = vst [vmem:[#allocation2] sm:$0xff] %v1343_v31  ;;  %v1338_v9 = vmul.f32 0.6931472, %v1913_v46 }
 0x266   : > { %v1340_v33 = vadd.f32 %v1338_v9, %v1324_v25 }
 0x268   : > { %v1671_v36 = vadd.f32 -0.6931472, %v1340_v33  ;;  %1350 = sbr.rel (%p1672_p2) target bundleno = 629 (0x275), region = 83 }
 0x26a   : > { %v1344_v27 = vadd.f32 %v1671_v36, %v1322_v37 }
 0x26c   : > { %1346 = vst [vmem:[#allocation2 + $0x8] sm:$0xff] %v1344_v27 }
 0x26d   : > { %v1351_v26 = vld [vmem:[#allocation2] sm:$0xff] }
 0x26e   : > { %1353 = vst [vmem:[#allocation13] sm:$0xff] %v1351_v26 }
 0x273   : > { %v1352_v28 = vld [vmem:[#allocation2 + $0x8] sm:$0xff] }
 0x274   : > { %1354 = vst [vmem:[#allocation13 + $0x8] sm:$0xff] %v1352_v28 }
 0x275 PF: > { %s2612_s16 = sadd.s32 4294967295, %s2088_s28   ;;  %s1362_s30 = sshll.u32 %s2598_s11, 4  ;;  %s1363_s30 = int_to_ptr.hbm [resolvable:$true] %s1362_s30 }
 0x276   : > { %p1736_p3 = scmp.eq.s32.totalorder %s2612_s16, 1  ;;  %s2101_s9 = smov [#allocation13]  }
 0x277   : > { %s1360_s1 = sshll.u32 %s2101_s9, 4  ;;  %s2102_s24 = smov 128   ;;  %s1361_s1 = int_to_ptr.vmem [resolvable:$true] %s1360_s1 }
 0x278   : > { %s2103_s14 = smov 8  }
 0x279   : > { %1727 = dma.vmem_to_hbm [thread:$0]  (%p1736_p3), %s1361_s1, 256, %s1363_s30, [#allocation12], %s2102_s24, %s2102_s24, %s2103_s14  }
 0x27a   : > { %2063 = dma.done.wait (%p1736_p3), [#allocation12], 256  }
 0x27b   : > { %2065 = vsyncadd (%p1736_p3), [#allocation12], 4294967040 }
 0x27c PF: > { %s38_s28 = sadd.s32 1, %s2088_s28   ;;  %s2613_s27 = sld [smem:[#allocation24_spill]] }
 0x27d   : > { %p35_p4 = scmp.ge.s32.totalorder %s38_s28, 4   ;;  %s2614_s18 = sld [smem:[#allocation22_spill]] }
 0x27e   : > { %s2615_s1 = sld [smem:[#allocation23_spill]]  ;;  %s2616_s25 = smov %s2072_s26 }
 0x27f   : > { %s2617_s26 = smov %s2076_s0  ;;  %37 = sbr.rel (!%p35_p4) target bundleno = 13 (0xd), region = 160 }
 0x282   : > { %s2618_s0 = smov %s2613_s27 }
 0x283   : > { %s2619_s27 = smov %s2614_s18 }
 0x284   :  { %1379 = vsyncpa [#allocation11], 1 }
 0x285   :  { %1381 = vsyncpa [#allocation11 + $0x1], 1 }
 0x286   :  { %1382 = vsyncpa [#allocation12], 1 }
 0x287   :  { %1384 = vsyncpa [#allocation12 + $0x1], 1 }
 0x288   :  { %1385 = vsyncmov [#allocation6] }
 0x28b   :  { %s1386_s2 = vpop.sfrf %1385 }
 0x28c   :  { %p1677_p5 = scmp.ne.s32.totalorder %s1386_s2, 0 }
 0x28e   :  { %1390 = shalt.err (%p1677_p5)  }

</bundles_post_ra>
